<compile_context>
chip_gen: v6e
topology: v6e:2x2x1
jax: 0.10.0
libtpu: 0.0.40
codegen_flags: <defaults>
</compile_context>

<pallas_src>
import numpy as np
import jax
import jax.numpy as jnp
from jax import lax
from jax.experimental import pallas as pl
from jax.experimental.pallas import tpu as pltpu


def lstm_decoder_kernel(x_ref, w_ih_ref, w_hh_ref, b_ref, wp_ref, bp_ref,
                        lens_ref, out_ref, seq_ref, gates_ref):
    Bb, H = x_ref.shape
    O = wp_ref.shape[1]
    L = w_ih_ref.shape[0]
    T = seq_ref.shape[0] // Bb
    unroll = True if T <= 16 else 4                 # static trip count

    zeros = jnp.zeros((Bb, H), jnp.float32)
    lens_col = lens_ref[...]                        # (Bb, 1) int32

    def gate_update(gates, c):
        i_g = jax.nn.sigmoid(gates[:, 0:H])
        f_g = jax.nn.sigmoid(gates[:, H:2 * H])
        g_g = jnp.tanh(gates[:, 2 * H:3 * H])
        o_g = jax.nn.sigmoid(gates[:, 3 * H:4 * H])
        c = f_g * c + i_g * g_g
        h = o_g * jnp.tanh(c)
        return h, c

    def run_layer(layer, is_last):
        w_hh = w_hh_ref[layer]                      # (H, 4H) bf16, VMEM-resident
        if layer == 0:
            # Layer-0 input is the same vector x at every timestep -> project ONCE.
            gates_x = (jnp.dot(x_ref[...].astype(jnp.bfloat16), w_ih_ref[0],
                               preferred_element_type=jnp.float32)
                       + b_ref[0])                  # (Bb, 4H) f32
        else:
            # All timesteps' input-gate contributions in ONE bf16 MXU op (bias folded).
            gates_ref[...] = (jnp.dot(seq_ref[...].astype(jnp.bfloat16),
                                      w_ih_ref[layer],
                                      preferred_element_type=jnp.float32)
                              + b_ref[layer])       # (T*Bb, 4H) f32

        def step(t, carry):
            h, c = carry
            row0 = pl.multiple_of(t * Bb, Bb)
            if layer == 0:
                g_in = gates_x
            else:
                g_in = gates_ref[pl.ds(row0, Bb), :]
            gates = g_in + jnp.dot(h.astype(jnp.bfloat16), w_hh,
                                   preferred_element_type=jnp.float32)
            h, c = gate_update(gates, c)
            if is_last:
                # pad_packed_sequence masking fused into the last layer's store.
                h_store = h * (t < lens_col).astype(jnp.float32)
            else:
                h_store = h
            seq_ref[pl.ds(row0, Bb), :] = h_store
            return (h, c)

        lax.fori_loop(0, T, step, (zeros, zeros), unroll=unroll)

    for l in range(L):                              # static layer loop
        run_layer(l, is_last=(l == L - 1))

    # Final projection: one bf16 matmul over all T*Bb rows; masked rows give exactly bias.
    out = (jnp.dot(seq_ref[...].astype(jnp.bfloat16), wp_ref[...],
                   preferred_element_type=jnp.float32)
           + bp_ref[...])                           # (T*Bb, O) f32, time-major

    # Scatter to lane-dense batch-first layout (Bb, T*O) with static lane-window stores.
    for t in range(T):
        out_ref[:, t * O:(t + 1) * O] = out[t * Bb:(t + 1) * Bb, :]


def lstm_decoder_forward(x, lens, params, max_len, *, b_block=None):
    B, H = x.shape
    O = params["w_proj"].shape[1]
    L = params["w_ih_t"].shape[0]
    H4 = 4 * H
    T = int(max_len)

    # Batch block: multiple of 8 (f32 sublanes); grow toward 128 to fill MXU rows when
    # the batch allows (v5e MXU is 128 rows; >128 buys little and costs VMEM).
    if b_block is None:
        b_block = min(128, -(-B // 8) * 8)
    b_block = max(8, -(-b_block // 8) * 8)
    B_pad = -(-B // b_block) * b_block

    lens_i32 = lens.astype(jnp.int32)
    if B_pad != B:
        x_p = jnp.zeros((B_pad, H), x.dtype).at[:B].set(x)
        lens_p = jnp.zeros((B_pad,), jnp.int32).at[:B].set(lens_i32)
    else:
        x_p, lens_p = x, lens_i32
    lens2d = lens_p.reshape(B_pad, 1)

    # bf16 MXU operands; biases / activations / accumulation stay f32.
    w_ih_bf = params["w_ih_t"].astype(jnp.bfloat16)
    w_hh_bf = params["w_hh_t"].astype(jnp.bfloat16)
    wp_bf = params["w_proj"].astype(jnp.bfloat16)

    # VMEM budget from actual need (v7x: 64 MiB / TensorCore physical).
    scratch_bytes = T * b_block * (H + H4) * 4
    weight_bytes = 2 * L * H * H4 * 2 + L * H4 * 4 + H * O * 2 + O * 4
    block_bytes = b_block * (max(H, 128) + 128 + max(T * O, 128)) * 4
    need = scratch_bytes + 2 * (weight_bytes + block_bytes)   # double-buffered blocks
    vmem_limit = int(min(48 * 1024 * 1024, max(4 * 1024 * 1024, 2 * need)))

    grid = (B_pad // b_block,)

    out_flat = pl.pallas_call(
        lstm_decoder_kernel,
        out_shape=jax.ShapeDtypeStruct((B_pad, T * O), jnp.float32),
        grid_spec=pltpu.PrefetchScalarGridSpec(
            num_scalar_prefetch=0,
            grid=grid,
            in_specs=[
                pl.BlockSpec((b_block, H), lambda i: (i, 0)),     # x
                pl.BlockSpec((L, H, H4), lambda i: (0, 0, 0)),    # w_ih_t (bf16, resident)
                pl.BlockSpec((L, H, H4), lambda i: (0, 0, 0)),    # w_hh_t (bf16, resident)
                pl.BlockSpec((L, 1, H4), lambda i: (0, 0, 0)),    # b      (f32,  resident)
                pl.BlockSpec((H, O), lambda i: (0, 0)),           # w_proj (bf16, resident)
                pl.BlockSpec((1, O), lambda i: (0, 0)),           # b_proj (f32,  resident)
                pl.BlockSpec((b_block, 1), lambda i: (i, 0)),     # lens
            ],
            out_specs=pl.BlockSpec((b_block, T * O), lambda i: (i, 0)),
            scratch_shapes=[
                pltpu.VMEM((T * b_block, H), jnp.float32),        # hidden sequence (in-place)
                pltpu.VMEM((T * b_block, H4), jnp.float32),       # precomputed input gates
            ],
        ),
        compiler_params=pltpu.CompilerParams(
            dimension_semantics=("parallel",),          # batch blocks -> both TCs on v7x
            vmem_limit_bytes=vmem_limit,
        ),
    )(x_p, w_ih_bf, w_hh_bf, params["b"], wp_bf, params["b_proj"], lens2d)

    # (B_pad, T*O) -> (B, T, O): free row-major reshape + batch slice (no transpose pass).
    return out_flat.reshape(B_pad, T, O)[:B]


def init_params(key, hidden_dim, output_dim, num_layers):
    """Deterministic parameter init matching nn.LSTM / nn.Linear shapes (f32)."""
    H, O, L = hidden_dim, output_dim, num_layers
    k = 1.0 / np.sqrt(H)
    keys = jax.random.split(key, 4 * L + 2)
    w_ih, w_hh, b = [], [], []
    for l in range(L):
        kw_ih, kw_hh, kb_ih, kb_hh = keys[4 * l:4 * l + 4]
        w_ih_l = jax.random.uniform(kw_ih, (4 * H, H), jnp.float32, -k, k)
        w_hh_l = jax.random.uniform(kw_hh, (4 * H, H), jnp.float32, -k, k)
        b_ih_l = jax.random.uniform(kb_ih, (4 * H,), jnp.float32, -k, k)
        b_hh_l = jax.random.uniform(kb_hh, (4 * H,), jnp.float32, -k, k)
        w_ih.append(w_ih_l.T)                    # (H, 4H), gate order i,f,g,o
        w_hh.append(w_hh_l.T)                    # (H, 4H)
        b.append((b_ih_l + b_hh_l)[None, :])     # (1, 4H)
    wp = jax.random.uniform(keys[-2], (O, H), jnp.float32, -k, k)
    bp = jax.random.uniform(keys[-1], (O,), jnp.float32, -k, k)
    return dict(
        w_ih_t=jnp.stack(w_ih),      # (L, H, 4H)
        w_hh_t=jnp.stack(w_hh),      # (L, H, 4H)
        b=jnp.stack(b),              # (L, 1, 4H)
        w_proj=wp.T,                 # (H, O)
        b_proj=bp[None, :],          # (1, O)
    )


def reference_forward(x, lens, params, max_len):
    """Pure-JAX f32 reference with identical math (for correctness check)."""
    B, H = x.shape
    L = params["w_ih_t"].shape[0]
    T = int(max_len)
    inp = jnp.broadcast_to(x[:, None, :], (B, T, H))
    for l in range(L):
        w_ih, w_hh, bias = params["w_ih_t"][l], params["w_hh_t"][l], params["b"][l]

        def step(carry, x_t):
            h, c = carry
            gates = x_t @ w_ih + h @ w_hh + bias
            i = jax.nn.sigmoid(gates[:, :H])
            f = jax.nn.sigmoid(gates[:, H:2 * H])
            g = jnp.tanh(gates[:, 2 * H:3 * H])
            o = jax.nn.sigmoid(gates[:, 3 * H:])
            c = f * c + i * g
            h = o * jnp.tanh(c)
            return (h, c), h

        init = (jnp.zeros((B, H), jnp.float32), jnp.zeros((B, H), jnp.float32))
        _, hs = lax.scan(step, init, jnp.transpose(inp, (1, 0, 2)))
        inp = jnp.transpose(hs, (1, 0, 2))
    mask = (jnp.arange(T)[None, :] < lens[:, None]).astype(jnp.float32)
    inp = inp * mask[:, :, None]
    return inp @ params["w_proj"] + params["b_proj"][0]


if __name__ == "__main__":
    hidden_dim, output_dim, num_layers = 32, 16, 2
    word_size = 100  # unused in the decoder forward pass
    B = 2
    lens = jnp.array([8, 5], dtype=jnp.int32)
    max_len = 8  # = max(lens), kept static

    key = jax.random.PRNGKey(0)
    kx, kp = jax.random.split(key)
    x = jax.random.normal(kx, (B, hidden_dim), jnp.float32)
    params = init_params(kp, hidden_dim, output_dim, num_layers)

    out = lstm_decoder_forward(x, lens, params, max_len)
    out = jax.block_until_ready(out)
    assert out.shape == (B, max_len, output_dim)

    # Reference: pure-f32 math on the same bf16-quantized weight values the kernel feeds
    # the MXU; the remaining diff is bf16 operand rounding + MXU accumulation order.
    params_q = dict(params)
    for name in ("w_ih_t", "w_hh_t", "w_proj"):
        params_q[name] = params[name].astype(jnp.bfloat16).astype(jnp.float32)
    ref = reference_forward(x, lens, params_q, max_len)
    np.testing.assert_allclose(np.asarray(out), np.asarray(ref), rtol=2e-2, atol=2e-2)
    print("KERNEL_OK")
</pallas_src>

<mosaic_0001>
module attributes {stable_mosaic.version = 11 : i64} {
  func.func @lstm_decoder_kernel(%arg0: i32, %arg1: memref<8x32xf32, #tpu.memory_space<vmem>>, %arg2: memref<2x32x128xbf16, #tpu.memory_space<vmem>>, %arg3: memref<2x32x128xbf16, #tpu.memory_space<vmem>>, %arg4: memref<2x1x128xf32, #tpu.memory_space<vmem>>, %arg5: memref<32x16xbf16, #tpu.memory_space<vmem>>, %arg6: memref<1x16xf32, #tpu.memory_space<vmem>>, %arg7: memref<8x1xi32, #tpu.memory_space<vmem>>, %arg8: memref<8x128xf32, #tpu.memory_space<vmem>>, %arg9: memref<64x32xf32, #tpu.memory_space<vmem>>, %arg10: memref<64x128xf32, #tpu.memory_space<vmem>>) attributes {dimension_semantics = [#tpu.dimension_semantics<parallel>], iteration_bounds = array<i64: 1>, scalar_prefetch = 0 : i64, scratch_operands = 2 : i64, tpu.core_type = #tpu.core_type<tc>, window_params = [{transform_indices = @transform_0, window_bounds = array<i64: 8, 32>}, {pipeline_mode = #tpu.pipeline_mode<synchronous>, transform_indices = @transform_1, window_bounds = array<i64: 2, 32, 128>}, {pipeline_mode = #tpu.pipeline_mode<synchronous>, transform_indices = @transform_2, window_bounds = array<i64: 2, 32, 128>}, {pipeline_mode = #tpu.pipeline_mode<synchronous>, transform_indices = @transform_3, window_bounds = array<i64: 2, 1, 128>}, {pipeline_mode = #tpu.pipeline_mode<synchronous>, transform_indices = @transform_4, window_bounds = array<i64: 32, 16>}, {pipeline_mode = #tpu.pipeline_mode<synchronous>, transform_indices = @transform_5, window_bounds = array<i64: 1, 16>}, {transform_indices = @transform_6, window_bounds = array<i64: 8, 1>}, {transform_indices = @transform_7, window_bounds = array<i64: 8, 128>}]} {
    %cst = arith.constant 0.000000e+00 : f32
    %0 = vector.broadcast %cst : f32 to vector<8x32xf32>
    %c0 = arith.constant 0 : index
    %c0_0 = arith.constant 0 : index
    %1 = vector.load %arg7[%c0, %c0_0] : memref<8x1xi32, #tpu.memory_space<vmem>>, vector<8x1xi32>
    %c0_1 = arith.constant 0 : index
    %c0_2 = arith.constant 0 : index
    %c0_3 = arith.constant 0 : index
    %2 = vector.load %arg3[%c0_1, %c0_2, %c0_3] : memref<2x32x128xbf16, #tpu.memory_space<vmem>>, vector<1x32x128xbf16>
    %3 = vector.shape_cast %2 : vector<1x32x128xbf16> to vector<32x128xbf16>
    %c0_4 = arith.constant 0 : index
    %c0_5 = arith.constant 0 : index
    %4 = vector.load %arg1[%c0_4, %c0_5] : memref<8x32xf32, #tpu.memory_space<vmem>>, vector<8x32xf32>
    %5 = arith.truncf %4 : vector<8x32xf32> to vector<8x32xbf16>
    %c0_6 = arith.constant 0 : index
    %c0_7 = arith.constant 0 : index
    %c0_8 = arith.constant 0 : index
    %6 = vector.load %arg2[%c0_6, %c0_7, %c0_8] : memref<2x32x128xbf16, #tpu.memory_space<vmem>>, vector<1x32x128xbf16>
    %7 = vector.shape_cast %6 : vector<1x32x128xbf16> to vector<32x128xbf16>
    %cst_9 = arith.constant dense<0.000000e+00> : vector<8x128xf32>
    %8 = tpu.matmul %5, %7, %cst_9 {dimension_numbers = #tpu.dot_dimension_numbers<[1], [0], [0], [1], [0, 0, 1, 1], [], []>} : vector<8x32xbf16>, vector<32x128xbf16>, vector<8x128xf32> -> vector<8x128xf32>
    %c0_10 = arith.constant 0 : index
    %c0_11 = arith.constant 0 : index
    %c0_12 = arith.constant 0 : index
    %9 = vector.load %arg4[%c0_10, %c0_11, %c0_12] : memref<2x1x128xf32, #tpu.memory_space<vmem>>, vector<1x1x128xf32>
    %10 = vector.shape_cast %9 : vector<1x1x128xf32> to vector<1x128xf32>
    %11 = vector.broadcast %10 : vector<1x128xf32> to vector<8x128xf32>
    %12 = arith.addf %8, %11 : vector<8x128xf32>
    %c0_i32 = arith.constant 0 : i32
    %c8_i32 = arith.constant 8 : i32
    %13 = arith.muli %c0_i32, %c8_i32 : i32
    %14 = tpu.assume_multiple %13, 8 : i32
    %15 = arith.truncf %0 : vector<8x32xf32> to vector<8x32xbf16>
    %cst_13 = arith.constant dense<0.000000e+00> : vector<8x128xf32>
    %16 = tpu.matmul %15, %3, %cst_13 {dimension_numbers = #tpu.dot_dimension_numbers<[1], [0], [0], [1], [0, 0, 1, 1], [], []>} : vector<8x32xbf16>, vector<32x128xbf16>, vector<8x128xf32> -> vector<8x128xf32>
    %17 = arith.addf %12, %16 : vector<8x128xf32>
    %18 = vector.extract_strided_slice %17 {offsets = [0, 0], sizes = [8, 32], strides = [1, 1]} : vector<8x128xf32> to vector<8x32xf32>
    %19 = arith.negf %18 : vector<8x32xf32>
    %20 = math.exp %19 : vector<8x32xf32>
    %cst_14 = arith.constant 1.000000e+00 : f32
    %21 = vector.broadcast %cst_14 : f32 to vector<8x32xf32>
    %22 = arith.addf %21, %20 : vector<8x32xf32>
    %23 = arith.divf %21, %22 : vector<8x32xf32>
    %24 = vector.extract_strided_slice %17 {offsets = [0, 32], sizes = [8, 32], strides = [1, 1]} : vector<8x128xf32> to vector<8x32xf32>
    %25 = arith.negf %24 : vector<8x32xf32>
    %26 = math.exp %25 : vector<8x32xf32>
    %cst_15 = arith.constant 1.000000e+00 : f32
    %27 = vector.broadcast %cst_15 : f32 to vector<8x32xf32>
    %28 = arith.addf %27, %26 : vector<8x32xf32>
    %29 = arith.divf %27, %28 : vector<8x32xf32>
    %30 = vector.extract_strided_slice %17 {offsets = [0, 64], sizes = [8, 32], strides = [1, 1]} : vector<8x128xf32> to vector<8x32xf32>
    %31 = math.tanh %30 : vector<8x32xf32>
    %32 = vector.extract_strided_slice %17 {offsets = [0, 96], sizes = [8, 32], strides = [1, 1]} : vector<8x128xf32> to vector<8x32xf32>
    %33 = arith.negf %32 : vector<8x32xf32>
    %34 = math.exp %33 : vector<8x32xf32>
    %cst_16 = arith.constant 1.000000e+00 : f32
    %35 = vector.broadcast %cst_16 : f32 to vector<8x32xf32>
    %36 = arith.addf %35, %34 : vector<8x32xf32>
    %37 = arith.divf %35, %36 : vector<8x32xf32>
    %38 = arith.mulf %29, %0 : vector<8x32xf32>
    %39 = arith.mulf %23, %31 : vector<8x32xf32>
    %40 = arith.addf %38, %39 : vector<8x32xf32>
    %41 = math.tanh %40 : vector<8x32xf32>
    %42 = arith.mulf %37, %41 : vector<8x32xf32>
    %43 = arith.index_cast %14 : i32 to index
    %c0_17 = arith.constant 0 : index
    %44 = vector.load %arg9[%43, %c0_17] : memref<64x32xf32, #tpu.memory_space<vmem>>, vector<8x32xf32>
    tpu.vector_store %arg9[%43, %c0_17], %42 {strides = array<i32>} : memref<64x32xf32, #tpu.memory_space<vmem>>, vector<8x32xf32>,
    %c1_i32 = arith.constant 1 : i32
    %c8_i32_18 = arith.constant 8 : i32
    %45 = arith.muli %c1_i32, %c8_i32_18 : i32
    %46 = tpu.assume_multiple %45, 8 : i32
    %47 = arith.truncf %42 : vector<8x32xf32> to vector<8x32xbf16>
    %cst_19 = arith.constant dense<0.000000e+00> : vector<8x128xf32>
    %48 = tpu.matmul %47, %3, %cst_19 {dimension_numbers = #tpu.dot_dimension_numbers<[1], [0], [0], [1], [0, 0, 1, 1], [], []>} : vector<8x32xbf16>, vector<32x128xbf16>, vector<8x128xf32> -> vector<8x128xf32>
    %49 = arith.addf %12, %48 : vector<8x128xf32>
    %50 = vector.extract_strided_slice %49 {offsets = [0, 0], sizes = [8, 32], strides = [1, 1]} : vector<8x128xf32> to vector<8x32xf32>
    %51 = arith.negf %50 : vector<8x32xf32>
    %52 = math.exp %51 : vector<8x32xf32>
    %cst_20 = arith.constant 1.000000e+00 : f32
    %53 = vector.broadcast %cst_20 : f32 to vector<8x32xf32>
    %54 = arith.addf %53, %52 : vector<8x32xf32>
    %55 = arith.divf %53, %54 : vector<8x32xf32>
    %56 = vector.extract_strided_slice %49 {offsets = [0, 32], sizes = [8, 32], strides = [1, 1]} : vector<8x128xf32> to vector<8x32xf32>
    %57 = arith.negf %56 : vector<8x32xf32>
    %58 = math.exp %57 : vector<8x32xf32>
    %cst_21 = arith.constant 1.000000e+00 : f32
    %59 = vector.broadcast %cst_21 : f32 to vector<8x32xf32>
    %60 = arith.addf %59, %58 : vector<8x32xf32>
    %61 = arith.divf %59, %60 : vector<8x32xf32>
    %62 = vector.extract_strided_slice %49 {offsets = [0, 64], sizes = [8, 32], strides = [1, 1]} : vector<8x128xf32> to vector<8x32xf32>
    %63 = math.tanh %62 : vector<8x32xf32>
    %64 = vector.extract_strided_slice %49 {offsets = [0, 96], sizes = [8, 32], strides = [1, 1]} : vector<8x128xf32> to vector<8x32xf32>
    %65 = arith.negf %64 : vector<8x32xf32>
    %66 = math.exp %65 : vector<8x32xf32>
    %cst_22 = arith.constant 1.000000e+00 : f32
    %67 = vector.broadcast %cst_22 : f32 to vector<8x32xf32>
    %68 = arith.addf %67, %66 : vector<8x32xf32>
    %69 = arith.divf %67, %68 : vector<8x32xf32>
    %70 = arith.mulf %61, %40 : vector<8x32xf32>
    %71 = arith.mulf %55, %63 : vector<8x32xf32>
    %72 = arith.addf %70, %71 : vector<8x32xf32>
    %73 = math.tanh %72 : vector<8x32xf32>
    %74 = arith.mulf %69, %73 : vector<8x32xf32>
    %75 = arith.index_cast %46 : i32 to index
    %c0_23 = arith.constant 0 : index
    %76 = vector.load %arg9[%75, %c0_23] : memref<64x32xf32, #tpu.memory_space<vmem>>, vector<8x32xf32>
    tpu.vector_store %arg9[%75, %c0_23], %74 {strides = array<i32>} : memref<64x32xf32, #tpu.memory_space<vmem>>, vector<8x32xf32>,
    %c2_i32 = arith.constant 2 : i32
    %c8_i32_24 = arith.constant 8 : i32
    %77 = arith.muli %c2_i32, %c8_i32_24 : i32
    %78 = tpu.assume_multiple %77, 8 : i32
    %79 = arith.truncf %74 : vector<8x32xf32> to vector<8x32xbf16>
    %cst_25 = arith.constant dense<0.000000e+00> : vector<8x128xf32>
    %80 = tpu.matmul %79, %3, %cst_25 {dimension_numbers = #tpu.dot_dimension_numbers<[1], [0], [0], [1], [0, 0, 1, 1], [], []>} : vector<8x32xbf16>, vector<32x128xbf16>, vector<8x128xf32> -> vector<8x128xf32>
    %81 = arith.addf %12, %80 : vector<8x128xf32>
    %82 = vector.extract_strided_slice %81 {offsets = [0, 0], sizes = [8, 32], strides = [1, 1]} : vector<8x128xf32> to vector<8x32xf32>
    %83 = arith.negf %82 : vector<8x32xf32>
    %84 = math.exp %83 : vector<8x32xf32>
    %cst_26 = arith.constant 1.000000e+00 : f32
    %85 = vector.broadcast %cst_26 : f32 to vector<8x32xf32>
    %86 = arith.addf %85, %84 : vector<8x32xf32>
    %87 = arith.divf %85, %86 : vector<8x32xf32>
    %88 = vector.extract_strided_slice %81 {offsets = [0, 32], sizes = [8, 32], strides = [1, 1]} : vector<8x128xf32> to vector<8x32xf32>
    %89 = arith.negf %88 : vector<8x32xf32>
    %90 = math.exp %89 : vector<8x32xf32>
    %cst_27 = arith.constant 1.000000e+00 : f32
    %91 = vector.broadcast %cst_27 : f32 to vector<8x32xf32>
    %92 = arith.addf %91, %90 : vector<8x32xf32>
    %93 = arith.divf %91, %92 : vector<8x32xf32>
    %94 = vector.extract_strided_slice %81 {offsets = [0, 64], sizes = [8, 32], strides = [1, 1]} : vector<8x128xf32> to vector<8x32xf32>
    %95 = math.tanh %94 : vector<8x32xf32>
    %96 = vector.extract_strided_slice %81 {offsets = [0, 96], sizes = [8, 32], strides = [1, 1]} : vector<8x128xf32> to vector<8x32xf32>
    %97 = arith.negf %96 : vector<8x32xf32>
    %98 = math.exp %97 : vector<8x32xf32>
    %cst_28 = arith.constant 1.000000e+00 : f32
    %99 = vector.broadcast %cst_28 : f32 to vector<8x32xf32>
    %100 = arith.addf %99, %98 : vector<8x32xf32>
    %101 = arith.divf %99, %100 : vector<8x32xf32>
    %102 = arith.mulf %93, %72 : vector<8x32xf32>
    %103 = arith.mulf %87, %95 : vector<8x32xf32>
    %104 = arith.addf %102, %103 : vector<8x32xf32>
    %105 = math.tanh %104 : vector<8x32xf32>
    %106 = arith.mulf %101, %105 : vector<8x32xf32>
    %107 = arith.index_cast %78 : i32 to index
    %c0_29 = arith.constant 0 : index
    %108 = vector.load %arg9[%107, %c0_29] : memref<64x32xf32, #tpu.memory_space<vmem>>, vector<8x32xf32>
    tpu.vector_store %arg9[%107, %c0_29], %106 {strides = array<i32>} : memref<64x32xf32, #tpu.memory_space<vmem>>, vector<8x32xf32>,
    %c3_i32 = arith.constant 3 : i32
    %c8_i32_30 = arith.constant 8 : i32
    %109 = arith.muli %c3_i32, %c8_i32_30 : i32
    %110 = tpu.assume_multiple %109, 8 : i32
    %111 = arith.truncf %106 : vector<8x32xf32> to vector<8x32xbf16>
    %cst_31 = arith.constant dense<0.000000e+00> : vector<8x128xf32>
    %112 = tpu.matmul %111, %3, %cst_31 {dimension_numbers = #tpu.dot_dimension_numbers<[1], [0], [0], [1], [0, 0, 1, 1], [], []>} : vector<8x32xbf16>, vector<32x128xbf16>, vector<8x128xf32> -> vector<8x128xf32>
    %113 = arith.addf %12, %112 : vector<8x128xf32>
    %114 = vector.extract_strided_slice %113 {offsets = [0, 0], sizes = [8, 32], strides = [1, 1]} : vector<8x128xf32> to vector<8x32xf32>
    %115 = arith.negf %114 : vector<8x32xf32>
    %116 = math.exp %115 : vector<8x32xf32>
    %cst_32 = arith.constant 1.000000e+00 : f32
    %117 = vector.broadcast %cst_32 : f32 to vector<8x32xf32>
    %118 = arith.addf %117, %116 : vector<8x32xf32>
    %119 = arith.divf %117, %118 : vector<8x32xf32>
    %120 = vector.extract_strided_slice %113 {offsets = [0, 32], sizes = [8, 32], strides = [1, 1]} : vector<8x128xf32> to vector<8x32xf32>
    %121 = arith.negf %120 : vector<8x32xf32>
    %122 = math.exp %121 : vector<8x32xf32>
    %cst_33 = arith.constant 1.000000e+00 : f32
    %123 = vector.broadcast %cst_33 : f32 to vector<8x32xf32>
    %124 = arith.addf %123, %122 : vector<8x32xf32>
    %125 = arith.divf %123, %124 : vector<8x32xf32>
    %126 = vector.extract_strided_slice %113 {offsets = [0, 64], sizes = [8, 32], strides = [1, 1]} : vector<8x128xf32> to vector<8x32xf32>
    %127 = math.tanh %126 : vector<8x32xf32>
    %128 = vector.extract_strided_slice %113 {offsets = [0, 96], sizes = [8, 32], strides = [1, 1]} : vector<8x128xf32> to vector<8x32xf32>
    %129 = arith.negf %128 : vector<8x32xf32>
    %130 = math.exp %129 : vector<8x32xf32>
    %cst_34 = arith.constant 1.000000e+00 : f32
    %131 = vector.broadcast %cst_34 : f32 to vector<8x32xf32>
    %132 = arith.addf %131, %130 : vector<8x32xf32>
    %133 = arith.divf %131, %132 : vector<8x32xf32>
    %134 = arith.mulf %125, %104 : vector<8x32xf32>
    %135 = arith.mulf %119, %127 : vector<8x32xf32>
    %136 = arith.addf %134, %135 : vector<8x32xf32>
    %137 = math.tanh %136 : vector<8x32xf32>
    %138 = arith.mulf %133, %137 : vector<8x32xf32>
    %139 = arith.index_cast %110 : i32 to index
    %c0_35 = arith.constant 0 : index
    %140 = vector.load %arg9[%139, %c0_35] : memref<64x32xf32, #tpu.memory_space<vmem>>, vector<8x32xf32>
    tpu.vector_store %arg9[%139, %c0_35], %138 {strides = array<i32>} : memref<64x32xf32, #tpu.memory_space<vmem>>, vector<8x32xf32>,
    %c4_i32 = arith.constant 4 : i32
    %c8_i32_36 = arith.constant 8 : i32
    %141 = arith.muli %c4_i32, %c8_i32_36 : i32
    %142 = tpu.assume_multiple %141, 8 : i32
    %143 = arith.truncf %138 : vector<8x32xf32> to vector<8x32xbf16>
    %cst_37 = arith.constant dense<0.000000e+00> : vector<8x128xf32>
    %144 = tpu.matmul %143, %3, %cst_37 {dimension_numbers = #tpu.dot_dimension_numbers<[1], [0], [0], [1], [0, 0, 1, 1], [], []>} : vector<8x32xbf16>, vector<32x128xbf16>, vector<8x128xf32> -> vector<8x128xf32>
    %145 = arith.addf %12, %144 : vector<8x128xf32>
    %146 = vector.extract_strided_slice %145 {offsets = [0, 0], sizes = [8, 32], strides = [1, 1]} : vector<8x128xf32> to vector<8x32xf32>
    %147 = arith.negf %146 : vector<8x32xf32>
    %148 = math.exp %147 : vector<8x32xf32>
    %cst_38 = arith.constant 1.000000e+00 : f32
    %149 = vector.broadcast %cst_38 : f32 to vector<8x32xf32>
    %150 = arith.addf %149, %148 : vector<8x32xf32>
    %151 = arith.divf %149, %150 : vector<8x32xf32>
    %152 = vector.extract_strided_slice %145 {offsets = [0, 32], sizes = [8, 32], strides = [1, 1]} : vector<8x128xf32> to vector<8x32xf32>
    %153 = arith.negf %152 : vector<8x32xf32>
    %154 = math.exp %153 : vector<8x32xf32>
    %cst_39 = arith.constant 1.000000e+00 : f32
    %155 = vector.broadcast %cst_39 : f32 to vector<8x32xf32>
    %156 = arith.addf %155, %154 : vector<8x32xf32>
    %157 = arith.divf %155, %156 : vector<8x32xf32>
    %158 = vector.extract_strided_slice %145 {offsets = [0, 64], sizes = [8, 32], strides = [1, 1]} : vector<8x128xf32> to vector<8x32xf32>
    %159 = math.tanh %158 : vector<8x32xf32>
    %160 = vector.extract_strided_slice %145 {offsets = [0, 96], sizes = [8, 32], strides = [1, 1]} : vector<8x128xf32> to vector<8x32xf32>
    %161 = arith.negf %160 : vector<8x32xf32>
    %162 = math.exp %161 : vector<8x32xf32>
    %cst_40 = arith.constant 1.000000e+00 : f32
    %163 = vector.broadcast %cst_40 : f32 to vector<8x32xf32>
    %164 = arith.addf %163, %162 : vector<8x32xf32>
    %165 = arith.divf %163, %164 : vector<8x32xf32>
    %166 = arith.mulf %157, %136 : vector<8x32xf32>
    %167 = arith.mulf %151, %159 : vector<8x32xf32>
    %168 = arith.addf %166, %167 : vector<8x32xf32>
    %169 = math.tanh %168 : vector<8x32xf32>
    %170 = arith.mulf %165, %169 : vector<8x32xf32>
    %171 = arith.index_cast %142 : i32 to index
    %c0_41 = arith.constant 0 : index
    %172 = vector.load %arg9[%171, %c0_41] : memref<64x32xf32, #tpu.memory_space<vmem>>, vector<8x32xf32>
    tpu.vector_store %arg9[%171, %c0_41], %170 {strides = array<i32>} : memref<64x32xf32, #tpu.memory_space<vmem>>, vector<8x32xf32>,
    %c5_i32 = arith.constant 5 : i32
    %c8_i32_42 = arith.constant 8 : i32
    %173 = arith.muli %c5_i32, %c8_i32_42 : i32
    %174 = tpu.assume_multiple %173, 8 : i32
    %175 = arith.truncf %170 : vector<8x32xf32> to vector<8x32xbf16>
    %cst_43 = arith.constant dense<0.000000e+00> : vector<8x128xf32>
    %176 = tpu.matmul %175, %3, %cst_43 {dimension_numbers = #tpu.dot_dimension_numbers<[1], [0], [0], [1], [0, 0, 1, 1], [], []>} : vector<8x32xbf16>, vector<32x128xbf16>, vector<8x128xf32> -> vector<8x128xf32>
    %177 = arith.addf %12, %176 : vector<8x128xf32>
    %178 = vector.extract_strided_slice %177 {offsets = [0, 0], sizes = [8, 32], strides = [1, 1]} : vector<8x128xf32> to vector<8x32xf32>
    %179 = arith.negf %178 : vector<8x32xf32>
    %180 = math.exp %179 : vector<8x32xf32>
    %cst_44 = arith.constant 1.000000e+00 : f32
    %181 = vector.broadcast %cst_44 : f32 to vector<8x32xf32>
    %182 = arith.addf %181, %180 : vector<8x32xf32>
    %183 = arith.divf %181, %182 : vector<8x32xf32>
    %184 = vector.extract_strided_slice %177 {offsets = [0, 32], sizes = [8, 32], strides = [1, 1]} : vector<8x128xf32> to vector<8x32xf32>
    %185 = arith.negf %184 : vector<8x32xf32>
    %186 = math.exp %185 : vector<8x32xf32>
    %cst_45 = arith.constant 1.000000e+00 : f32
    %187 = vector.broadcast %cst_45 : f32 to vector<8x32xf32>
    %188 = arith.addf %187, %186 : vector<8x32xf32>
    %189 = arith.divf %187, %188 : vector<8x32xf32>
    %190 = vector.extract_strided_slice %177 {offsets = [0, 64], sizes = [8, 32], strides = [1, 1]} : vector<8x128xf32> to vector<8x32xf32>
    %191 = math.tanh %190 : vector<8x32xf32>
    %192 = vector.extract_strided_slice %177 {offsets = [0, 96], sizes = [8, 32], strides = [1, 1]} : vector<8x128xf32> to vector<8x32xf32>
    %193 = arith.negf %192 : vector<8x32xf32>
    %194 = math.exp %193 : vector<8x32xf32>
    %cst_46 = arith.constant 1.000000e+00 : f32
    %195 = vector.broadcast %cst_46 : f32 to vector<8x32xf32>
    %196 = arith.addf %195, %194 : vector<8x32xf32>
    %197 = arith.divf %195, %196 : vector<8x32xf32>
    %198 = arith.mulf %189, %168 : vector<8x32xf32>
    %199 = arith.mulf %183, %191 : vector<8x32xf32>
    %200 = arith.addf %198, %199 : vector<8x32xf32>
    %201 = math.tanh %200 : vector<8x32xf32>
    %202 = arith.mulf %197, %201 : vector<8x32xf32>
    %203 = arith.index_cast %174 : i32 to index
    %c0_47 = arith.constant 0 : index
    %204 = vector.load %arg9[%203, %c0_47] : memref<64x32xf32, #tpu.memory_space<vmem>>, vector<8x32xf32>
    tpu.vector_store %arg9[%203, %c0_47], %202 {strides = array<i32>} : memref<64x32xf32, #tpu.memory_space<vmem>>, vector<8x32xf32>,
    %c6_i32 = arith.constant 6 : i32
    %c8_i32_48 = arith.constant 8 : i32
    %205 = arith.muli %c6_i32, %c8_i32_48 : i32
    %206 = tpu.assume_multiple %205, 8 : i32
    %207 = arith.truncf %202 : vector<8x32xf32> to vector<8x32xbf16>
    %cst_49 = arith.constant dense<0.000000e+00> : vector<8x128xf32>
    %208 = tpu.matmul %207, %3, %cst_49 {dimension_numbers = #tpu.dot_dimension_numbers<[1], [0], [0], [1], [0, 0, 1, 1], [], []>} : vector<8x32xbf16>, vector<32x128xbf16>, vector<8x128xf32> -> vector<8x128xf32>
    %209 = arith.addf %12, %208 : vector<8x128xf32>
    %210 = vector.extract_strided_slice %209 {offsets = [0, 0], sizes = [8, 32], strides = [1, 1]} : vector<8x128xf32> to vector<8x32xf32>
    %211 = arith.negf %210 : vector<8x32xf32>
    %212 = math.exp %211 : vector<8x32xf32>
    %cst_50 = arith.constant 1.000000e+00 : f32
    %213 = vector.broadcast %cst_50 : f32 to vector<8x32xf32>
    %214 = arith.addf %213, %212 : vector<8x32xf32>
    %215 = arith.divf %213, %214 : vector<8x32xf32>
    %216 = vector.extract_strided_slice %209 {offsets = [0, 32], sizes = [8, 32], strides = [1, 1]} : vector<8x128xf32> to vector<8x32xf32>
    %217 = arith.negf %216 : vector<8x32xf32>
    %218 = math.exp %217 : vector<8x32xf32>
    %cst_51 = arith.constant 1.000000e+00 : f32
    %219 = vector.broadcast %cst_51 : f32 to vector<8x32xf32>
    %220 = arith.addf %219, %218 : vector<8x32xf32>
    %221 = arith.divf %219, %220 : vector<8x32xf32>
    %222 = vector.extract_strided_slice %209 {offsets = [0, 64], sizes = [8, 32], strides = [1, 1]} : vector<8x128xf32> to vector<8x32xf32>
    %223 = math.tanh %222 : vector<8x32xf32>
    %224 = vector.extract_strided_slice %209 {offsets = [0, 96], sizes = [8, 32], strides = [1, 1]} : vector<8x128xf32> to vector<8x32xf32>
    %225 = arith.negf %224 : vector<8x32xf32>
    %226 = math.exp %225 : vector<8x32xf32>
    %cst_52 = arith.constant 1.000000e+00 : f32
    %227 = vector.broadcast %cst_52 : f32 to vector<8x32xf32>
    %228 = arith.addf %227, %226 : vector<8x32xf32>
    %229 = arith.divf %227, %228 : vector<8x32xf32>
    %230 = arith.mulf %221, %200 : vector<8x32xf32>
    %231 = arith.mulf %215, %223 : vector<8x32xf32>
    %232 = arith.addf %230, %231 : vector<8x32xf32>
    %233 = math.tanh %232 : vector<8x32xf32>
    %234 = arith.mulf %229, %233 : vector<8x32xf32>
    %235 = arith.index_cast %206 : i32 to index
    %c0_53 = arith.constant 0 : index
    %236 = vector.load %arg9[%235, %c0_53] : memref<64x32xf32, #tpu.memory_space<vmem>>, vector<8x32xf32>
    tpu.vector_store %arg9[%235, %c0_53], %234 {strides = array<i32>} : memref<64x32xf32, #tpu.memory_space<vmem>>, vector<8x32xf32>,
    %c7_i32 = arith.constant 7 : i32
    %c8_i32_54 = arith.constant 8 : i32
    %237 = arith.muli %c7_i32, %c8_i32_54 : i32
    %238 = tpu.assume_multiple %237, 8 : i32
    %239 = arith.truncf %234 : vector<8x32xf32> to vector<8x32xbf16>
    %cst_55 = arith.constant dense<0.000000e+00> : vector<8x128xf32>
    %240 = tpu.matmul %239, %3, %cst_55 {dimension_numbers = #tpu.dot_dimension_numbers<[1], [0], [0], [1], [0, 0, 1, 1], [], []>} : vector<8x32xbf16>, vector<32x128xbf16>, vector<8x128xf32> -> vector<8x128xf32>
    %241 = arith.addf %12, %240 : vector<8x128xf32>
    %242 = vector.extract_strided_slice %241 {offsets = [0, 0], sizes = [8, 32], strides = [1, 1]} : vector<8x128xf32> to vector<8x32xf32>
    %243 = arith.negf %242 : vector<8x32xf32>
    %244 = math.exp %243 : vector<8x32xf32>
    %cst_56 = arith.constant 1.000000e+00 : f32
    %245 = vector.broadcast %cst_56 : f32 to vector<8x32xf32>
    %246 = arith.addf %245, %244 : vector<8x32xf32>
    %247 = arith.divf %245, %246 : vector<8x32xf32>
    %248 = vector.extract_strided_slice %241 {offsets = [0, 32], sizes = [8, 32], strides = [1, 1]} : vector<8x128xf32> to vector<8x32xf32>
    %249 = arith.negf %248 : vector<8x32xf32>
    %250 = math.exp %249 : vector<8x32xf32>
    %cst_57 = arith.constant 1.000000e+00 : f32
    %251 = vector.broadcast %cst_57 : f32 to vector<8x32xf32>
    %252 = arith.addf %251, %250 : vector<8x32xf32>
    %253 = arith.divf %251, %252 : vector<8x32xf32>
    %254 = vector.extract_strided_slice %241 {offsets = [0, 64], sizes = [8, 32], strides = [1, 1]} : vector<8x128xf32> to vector<8x32xf32>
    %255 = math.tanh %254 : vector<8x32xf32>
    %256 = vector.extract_strided_slice %241 {offsets = [0, 96], sizes = [8, 32], strides = [1, 1]} : vector<8x128xf32> to vector<8x32xf32>
    %257 = arith.negf %256 : vector<8x32xf32>
    %258 = math.exp %257 : vector<8x32xf32>
    %cst_58 = arith.constant 1.000000e+00 : f32
    %259 = vector.broadcast %cst_58 : f32 to vector<8x32xf32>
    %260 = arith.addf %259, %258 : vector<8x32xf32>
    %261 = arith.divf %259, %260 : vector<8x32xf32>
    %262 = arith.mulf %253, %232 : vector<8x32xf32>
    %263 = arith.mulf %247, %255 : vector<8x32xf32>
    %264 = arith.addf %262, %263 : vector<8x32xf32>
    %265 = math.tanh %264 : vector<8x32xf32>
    %266 = arith.mulf %261, %265 : vector<8x32xf32>
    %267 = arith.index_cast %238 : i32 to index
    %c0_59 = arith.constant 0 : index
    %268 = vector.load %arg9[%267, %c0_59] : memref<64x32xf32, #tpu.memory_space<vmem>>, vector<8x32xf32>
    tpu.vector_store %arg9[%267, %c0_59], %266 {strides = array<i32>} : memref<64x32xf32, #tpu.memory_space<vmem>>, vector<8x32xf32>,
    %c8_i32_60 = arith.constant 8 : i32
    %c1 = arith.constant 1 : index
    %c0_61 = arith.constant 0 : index
    %c0_62 = arith.constant 0 : index
    %269 = vector.load %arg3[%c1, %c0_61, %c0_62] : memref<2x32x128xbf16, #tpu.memory_space<vmem>>, vector<1x32x128xbf16>
    %270 = vector.shape_cast %269 : vector<1x32x128xbf16> to vector<32x128xbf16>
    %c0_63 = arith.constant 0 : index
    %c0_64 = arith.constant 0 : index
    %271 = vector.load %arg9[%c0_63, %c0_64] : memref<64x32xf32, #tpu.memory_space<vmem>>, vector<64x32xf32>
    %272 = arith.truncf %271 : vector<64x32xf32> to vector<64x32xbf16>
    %c1_65 = arith.constant 1 : index
    %c0_66 = arith.constant 0 : index
    %c0_67 = arith.constant 0 : index
    %273 = vector.load %arg2[%c1_65, %c0_66, %c0_67] : memref<2x32x128xbf16, #tpu.memory_space<vmem>>, vector<1x32x128xbf16>
    %274 = vector.shape_cast %273 : vector<1x32x128xbf16> to vector<32x128xbf16>
    %cst_68 = arith.constant dense<0.000000e+00> : vector<64x128xf32>
    %275 = tpu.matmul %272, %274, %cst_68 {dimension_numbers = #tpu.dot_dimension_numbers<[1], [0], [0], [1], [0, 0, 1, 1], [], []>} : vector<64x32xbf16>, vector<32x128xbf16>, vector<64x128xf32> -> vector<64x128xf32>
    %c1_69 = arith.constant 1 : index
    %c0_70 = arith.constant 0 : index
    %c0_71 = arith.constant 0 : index
    %276 = vector.load %arg4[%c1_69, %c0_70, %c0_71] : memref<2x1x128xf32, #tpu.memory_space<vmem>>, vector<1x1x128xf32>
    %277 = vector.shape_cast %276 : vector<1x1x128xf32> to vector<1x128xf32>
    %278 = vector.broadcast %277 : vector<1x128xf32> to vector<64x128xf32>
    %279 = arith.addf %275, %278 : vector<64x128xf32>
    %c0_72 = arith.constant 0 : index
    %c0_73 = arith.constant 0 : index
    %280 = vector.load %arg10[%c0_72, %c0_73] : memref<64x128xf32, #tpu.memory_space<vmem>>, vector<64x128xf32>
    tpu.vector_store %arg10[%c0_72, %c0_73], %279 {strides = array<i32>} : memref<64x128xf32, #tpu.memory_space<vmem>>, vector<64x128xf32>,
    %c0_i32_74 = arith.constant 0 : i32
    %c8_i32_75 = arith.constant 8 : i32
    %281 = arith.muli %c0_i32_74, %c8_i32_75 : i32
    %282 = tpu.assume_multiple %281, 8 : i32
    %283 = arith.index_cast %282 : i32 to index
    %c0_76 = arith.constant 0 : index
    %284 = vector.load %arg10[%283, %c0_76] : memref<64x128xf32, #tpu.memory_space<vmem>>, vector<8x128xf32>
    %285 = arith.truncf %0 : vector<8x32xf32> to vector<8x32xbf16>
    %cst_77 = arith.constant dense<0.000000e+00> : vector<8x128xf32>
    %286 = tpu.matmul %285, %270, %cst_77 {dimension_numbers = #tpu.dot_dimension_numbers<[1], [0], [0], [1], [0, 0, 1, 1], [], []>} : vector<8x32xbf16>, vector<32x128xbf16>, vector<8x128xf32> -> vector<8x128xf32>
    %287 = arith.addf %284, %286 : vector<8x128xf32>
    %288 = vector.extract_strided_slice %287 {offsets = [0, 0], sizes = [8, 32], strides = [1, 1]} : vector<8x128xf32> to vector<8x32xf32>
    %289 = arith.negf %288 : vector<8x32xf32>
    %290 = math.exp %289 : vector<8x32xf32>
    %cst_78 = arith.constant 1.000000e+00 : f32
    %291 = vector.broadcast %cst_78 : f32 to vector<8x32xf32>
    %292 = arith.addf %291, %290 : vector<8x32xf32>
    %293 = arith.divf %291, %292 : vector<8x32xf32>
    %294 = vector.extract_strided_slice %287 {offsets = [0, 32], sizes = [8, 32], strides = [1, 1]} : vector<8x128xf32> to vector<8x32xf32>
    %295 = arith.negf %294 : vector<8x32xf32>
    %296 = math.exp %295 : vector<8x32xf32>
    %cst_79 = arith.constant 1.000000e+00 : f32
    %297 = vector.broadcast %cst_79 : f32 to vector<8x32xf32>
    %298 = arith.addf %297, %296 : vector<8x32xf32>
    %299 = arith.divf %297, %298 : vector<8x32xf32>
    %300 = vector.extract_strided_slice %287 {offsets = [0, 64], sizes = [8, 32], strides = [1, 1]} : vector<8x128xf32> to vector<8x32xf32>
    %301 = math.tanh %300 : vector<8x32xf32>
    %302 = vector.extract_strided_slice %287 {offsets = [0, 96], sizes = [8, 32], strides = [1, 1]} : vector<8x128xf32> to vector<8x32xf32>
    %303 = arith.negf %302 : vector<8x32xf32>
    %304 = math.exp %303 : vector<8x32xf32>
    %cst_80 = arith.constant 1.000000e+00 : f32
    %305 = vector.broadcast %cst_80 : f32 to vector<8x32xf32>
    %306 = arith.addf %305, %304 : vector<8x32xf32>
    %307 = arith.divf %305, %306 : vector<8x32xf32>
    %308 = arith.mulf %299, %0 : vector<8x32xf32>
    %309 = arith.mulf %293, %301 : vector<8x32xf32>
    %310 = arith.addf %308, %309 : vector<8x32xf32>
    %311 = math.tanh %310 : vector<8x32xf32>
    %312 = arith.mulf %307, %311 : vector<8x32xf32>
    %313 = vector.broadcast %c0_i32_74 : i32 to vector<8x1xi32>
    %314 = arith.cmpi slt, %313, %1 : vector<8x1xi32>
    %315 = arith.extui %314 : vector<8x1xi1> to vector<8x1xi32>
    %316 = arith.sitofp %315 : vector<8x1xi32> to vector<8x1xf32>
    %317 = vector.broadcast %316 : vector<8x1xf32> to vector<8x32xf32>
    %318 = arith.mulf %312, %317 : vector<8x32xf32>
    %319 = arith.index_cast %282 : i32 to index
    %c0_81 = arith.constant 0 : index
    %320 = vector.load %arg9[%319, %c0_81] : memref<64x32xf32, #tpu.memory_space<vmem>>, vector<8x32xf32>
    tpu.vector_store %arg9[%319, %c0_81], %318 {strides = array<i32>} : memref<64x32xf32, #tpu.memory_space<vmem>>, vector<8x32xf32>,
    %c1_i32_82 = arith.constant 1 : i32
    %c8_i32_83 = arith.constant 8 : i32
    %321 = arith.muli %c1_i32_82, %c8_i32_83 : i32
    %322 = tpu.assume_multiple %321, 8 : i32
    %323 = arith.index_cast %322 : i32 to index
    %c0_84 = arith.constant 0 : index
    %324 = vector.load %arg10[%323, %c0_84] : memref<64x128xf32, #tpu.memory_space<vmem>>, vector<8x128xf32>
    %325 = arith.truncf %312 : vector<8x32xf32> to vector<8x32xbf16>
    %cst_85 = arith.constant dense<0.000000e+00> : vector<8x128xf32>
    %326 = tpu.matmul %325, %270, %cst_85 {dimension_numbers = #tpu.dot_dimension_numbers<[1], [0], [0], [1], [0, 0, 1, 1], [], []>} : vector<8x32xbf16>, vector<32x128xbf16>, vector<8x128xf32> -> vector<8x128xf32>
    %327 = arith.addf %324, %326 : vector<8x128xf32>
    %328 = vector.extract_strided_slice %327 {offsets = [0, 0], sizes = [8, 32], strides = [1, 1]} : vector<8x128xf32> to vector<8x32xf32>
    %329 = arith.negf %328 : vector<8x32xf32>
    %330 = math.exp %329 : vector<8x32xf32>
    %cst_86 = arith.constant 1.000000e+00 : f32
    %331 = vector.broadcast %cst_86 : f32 to vector<8x32xf32>
    %332 = arith.addf %331, %330 : vector<8x32xf32>
    %333 = arith.divf %331, %332 : vector<8x32xf32>
    %334 = vector.extract_strided_slice %327 {offsets = [0, 32], sizes = [8, 32], strides = [1, 1]} : vector<8x128xf32> to vector<8x32xf32>
    %335 = arith.negf %334 : vector<8x32xf32>
    %336 = math.exp %335 : vector<8x32xf32>
    %cst_87 = arith.constant 1.000000e+00 : f32
    %337 = vector.broadcast %cst_87 : f32 to vector<8x32xf32>
    %338 = arith.addf %337, %336 : vector<8x32xf32>
    %339 = arith.divf %337, %338 : vector<8x32xf32>
    %340 = vector.extract_strided_slice %327 {offsets = [0, 64], sizes = [8, 32], strides = [1, 1]} : vector<8x128xf32> to vector<8x32xf32>
    %341 = math.tanh %340 : vector<8x32xf32>
    %342 = vector.extract_strided_slice %327 {offsets = [0, 96], sizes = [8, 32], strides = [1, 1]} : vector<8x128xf32> to vector<8x32xf32>
    %343 = arith.negf %342 : vector<8x32xf32>
    %344 = math.exp %343 : vector<8x32xf32>
    %cst_88 = arith.constant 1.000000e+00 : f32
    %345 = vector.broadcast %cst_88 : f32 to vector<8x32xf32>
    %346 = arith.addf %345, %344 : vector<8x32xf32>
    %347 = arith.divf %345, %346 : vector<8x32xf32>
    %348 = arith.mulf %339, %310 : vector<8x32xf32>
    %349 = arith.mulf %333, %341 : vector<8x32xf32>
    %350 = arith.addf %348, %349 : vector<8x32xf32>
    %351 = math.tanh %350 : vector<8x32xf32>
    %352 = arith.mulf %347, %351 : vector<8x32xf32>
    %353 = vector.broadcast %c1_i32_82 : i32 to vector<8x1xi32>
    %354 = arith.cmpi slt, %353, %1 : vector<8x1xi32>
    %355 = arith.extui %354 : vector<8x1xi1> to vector<8x1xi32>
    %356 = arith.sitofp %355 : vector<8x1xi32> to vector<8x1xf32>
    %357 = vector.broadcast %356 : vector<8x1xf32> to vector<8x32xf32>
    %358 = arith.mulf %352, %357 : vector<8x32xf32>
    %359 = arith.index_cast %322 : i32 to index
    %c0_89 = arith.constant 0 : index
    %360 = vector.load %arg9[%359, %c0_89] : memref<64x32xf32, #tpu.memory_space<vmem>>, vector<8x32xf32>
    tpu.vector_store %arg9[%359, %c0_89], %358 {strides = array<i32>} : memref<64x32xf32, #tpu.memory_space<vmem>>, vector<8x32xf32>,
    %c2_i32_90 = arith.constant 2 : i32
    %c8_i32_91 = arith.constant 8 : i32
    %361 = arith.muli %c2_i32_90, %c8_i32_91 : i32
    %362 = tpu.assume_multiple %361, 8 : i32
    %363 = arith.index_cast %362 : i32 to index
    %c0_92 = arith.constant 0 : index
    %364 = vector.load %arg10[%363, %c0_92] : memref<64x128xf32, #tpu.memory_space<vmem>>, vector<8x128xf32>
    %365 = arith.truncf %352 : vector<8x32xf32> to vector<8x32xbf16>
    %cst_93 = arith.constant dense<0.000000e+00> : vector<8x128xf32>
    %366 = tpu.matmul %365, %270, %cst_93 {dimension_numbers = #tpu.dot_dimension_numbers<[1], [0], [0], [1], [0, 0, 1, 1], [], []>} : vector<8x32xbf16>, vector<32x128xbf16>, vector<8x128xf32> -> vector<8x128xf32>
    %367 = arith.addf %364, %366 : vector<8x128xf32>
    %368 = vector.extract_strided_slice %367 {offsets = [0, 0], sizes = [8, 32], strides = [1, 1]} : vector<8x128xf32> to vector<8x32xf32>
    %369 = arith.negf %368 : vector<8x32xf32>
    %370 = math.exp %369 : vector<8x32xf32>
    %cst_94 = arith.constant 1.000000e+00 : f32
    %371 = vector.broadcast %cst_94 : f32 to vector<8x32xf32>
    %372 = arith.addf %371, %370 : vector<8x32xf32>
    %373 = arith.divf %371, %372 : vector<8x32xf32>
    %374 = vector.extract_strided_slice %367 {offsets = [0, 32], sizes = [8, 32], strides = [1, 1]} : vector<8x128xf32> to vector<8x32xf32>
    %375 = arith.negf %374 : vector<8x32xf32>
    %376 = math.exp %375 : vector<8x32xf32>
    %cst_95 = arith.constant 1.000000e+00 : f32
    %377 = vector.broadcast %cst_95 : f32 to vector<8x32xf32>
    %378 = arith.addf %377, %376 : vector<8x32xf32>
    %379 = arith.divf %377, %378 : vector<8x32xf32>
    %380 = vector.extract_strided_slice %367 {offsets = [0, 64], sizes = [8, 32], strides = [1, 1]} : vector<8x128xf32> to vector<8x32xf32>
    %381 = math.tanh %380 : vector<8x32xf32>
    %382 = vector.extract_strided_slice %367 {offsets = [0, 96], sizes = [8, 32], strides = [1, 1]} : vector<8x128xf32> to vector<8x32xf32>
    %383 = arith.negf %382 : vector<8x32xf32>
    %384 = math.exp %383 : vector<8x32xf32>
    %cst_96 = arith.constant 1.000000e+00 : f32
    %385 = vector.broadcast %cst_96 : f32 to vector<8x32xf32>
    %386 = arith.addf %385, %384 : vector<8x32xf32>
    %387 = arith.divf %385, %386 : vector<8x32xf32>
    %388 = arith.mulf %379, %350 : vector<8x32xf32>
    %389 = arith.mulf %373, %381 : vector<8x32xf32>
    %390 = arith.addf %388, %389 : vector<8x32xf32>
    %391 = math.tanh %390 : vector<8x32xf32>
    %392 = arith.mulf %387, %391 : vector<8x32xf32>
    %393 = vector.broadcast %c2_i32_90 : i32 to vector<8x1xi32>
    %394 = arith.cmpi slt, %393, %1 : vector<8x1xi32>
    %395 = arith.extui %394 : vector<8x1xi1> to vector<8x1xi32>
    %396 = arith.sitofp %395 : vector<8x1xi32> to vector<8x1xf32>
    %397 = vector.broadcast %396 : vector<8x1xf32> to vector<8x32xf32>
    %398 = arith.mulf %392, %397 : vector<8x32xf32>
    %399 = arith.index_cast %362 : i32 to index
    %c0_97 = arith.constant 0 : index
    %400 = vector.load %arg9[%399, %c0_97] : memref<64x32xf32, #tpu.memory_space<vmem>>, vector<8x32xf32>
    tpu.vector_store %arg9[%399, %c0_97], %398 {strides = array<i32>} : memref<64x32xf32, #tpu.memory_space<vmem>>, vector<8x32xf32>,
    %c3_i32_98 = arith.constant 3 : i32
    %c8_i32_99 = arith.constant 8 : i32
    %401 = arith.muli %c3_i32_98, %c8_i32_99 : i32
    %402 = tpu.assume_multiple %401, 8 : i32
    %403 = arith.index_cast %402 : i32 to index
    %c0_100 = arith.constant 0 : index
    %404 = vector.load %arg10[%403, %c0_100] : memref<64x128xf32, #tpu.memory_space<vmem>>, vector<8x128xf32>
    %405 = arith.truncf %392 : vector<8x32xf32> to vector<8x32xbf16>
    %cst_101 = arith.constant dense<0.000000e+00> : vector<8x128xf32>
    %406 = tpu.matmul %405, %270, %cst_101 {dimension_numbers = #tpu.dot_dimension_numbers<[1], [0], [0], [1], [0, 0, 1, 1], [], []>} : vector<8x32xbf16>, vector<32x128xbf16>, vector<8x128xf32> -> vector<8x128xf32>
    %407 = arith.addf %404, %406 : vector<8x128xf32>
    %408 = vector.extract_strided_slice %407 {offsets = [0, 0], sizes = [8, 32], strides = [1, 1]} : vector<8x128xf32> to vector<8x32xf32>
    %409 = arith.negf %408 : vector<8x32xf32>
    %410 = math.exp %409 : vector<8x32xf32>
    %cst_102 = arith.constant 1.000000e+00 : f32
    %411 = vector.broadcast %cst_102 : f32 to vector<8x32xf32>
    %412 = arith.addf %411, %410 : vector<8x32xf32>
    %413 = arith.divf %411, %412 : vector<8x32xf32>
    %414 = vector.extract_strided_slice %407 {offsets = [0, 32], sizes = [8, 32], strides = [1, 1]} : vector<8x128xf32> to vector<8x32xf32>
    %415 = arith.negf %414 : vector<8x32xf32>
    %416 = math.exp %415 : vector<8x32xf32>
    %cst_103 = arith.constant 1.000000e+00 : f32
    %417 = vector.broadcast %cst_103 : f32 to vector<8x32xf32>
    %418 = arith.addf %417, %416 : vector<8x32xf32>
    %419 = arith.divf %417, %418 : vector<8x32xf32>
    %420 = vector.extract_strided_slice %407 {offsets = [0, 64], sizes = [8, 32], strides = [1, 1]} : vector<8x128xf32> to vector<8x32xf32>
    %421 = math.tanh %420 : vector<8x32xf32>
    %422 = vector.extract_strided_slice %407 {offsets = [0, 96], sizes = [8, 32], strides = [1, 1]} : vector<8x128xf32> to vector<8x32xf32>
    %423 = arith.negf %422 : vector<8x32xf32>
    %424 = math.exp %423 : vector<8x32xf32>
    %cst_104 = arith.constant 1.000000e+00 : f32
    %425 = vector.broadcast %cst_104 : f32 to vector<8x32xf32>
    %426 = arith.addf %425, %424 : vector<8x32xf32>
    %427 = arith.divf %425, %426 : vector<8x32xf32>
    %428 = arith.mulf %419, %390 : vector<8x32xf32>
    %429 = arith.mulf %413, %421 : vector<8x32xf32>
    %430 = arith.addf %428, %429 : vector<8x32xf32>
    %431 = math.tanh %430 : vector<8x32xf32>
    %432 = arith.mulf %427, %431 : vector<8x32xf32>
    %433 = vector.broadcast %c3_i32_98 : i32 to vector<8x1xi32>
    %434 = arith.cmpi slt, %433, %1 : vector<8x1xi32>
    %435 = arith.extui %434 : vector<8x1xi1> to vector<8x1xi32>
    %436 = arith.sitofp %435 : vector<8x1xi32> to vector<8x1xf32>
    %437 = vector.broadcast %436 : vector<8x1xf32> to vector<8x32xf32>
    %438 = arith.mulf %432, %437 : vector<8x32xf32>
    %439 = arith.index_cast %402 : i32 to index
    %c0_105 = arith.constant 0 : index
    %440 = vector.load %arg9[%439, %c0_105] : memref<64x32xf32, #tpu.memory_space<vmem>>, vector<8x32xf32>
    tpu.vector_store %arg9[%439, %c0_105], %438 {strides = array<i32>} : memref<64x32xf32, #tpu.memory_space<vmem>>, vector<8x32xf32>,
    %c4_i32_106 = arith.constant 4 : i32
    %c8_i32_107 = arith.constant 8 : i32
    %441 = arith.muli %c4_i32_106, %c8_i32_107 : i32
    %442 = tpu.assume_multiple %441, 8 : i32
    %443 = arith.index_cast %442 : i32 to index
    %c0_108 = arith.constant 0 : index
    %444 = vector.load %arg10[%443, %c0_108] : memref<64x128xf32, #tpu.memory_space<vmem>>, vector<8x128xf32>
    %445 = arith.truncf %432 : vector<8x32xf32> to vector<8x32xbf16>
    %cst_109 = arith.constant dense<0.000000e+00> : vector<8x128xf32>
    %446 = tpu.matmul %445, %270, %cst_109 {dimension_numbers = #tpu.dot_dimension_numbers<[1], [0], [0], [1], [0, 0, 1, 1], [], []>} : vector<8x32xbf16>, vector<32x128xbf16>, vector<8x128xf32> -> vector<8x128xf32>
    %447 = arith.addf %444, %446 : vector<8x128xf32>
    %448 = vector.extract_strided_slice %447 {offsets = [0, 0], sizes = [8, 32], strides = [1, 1]} : vector<8x128xf32> to vector<8x32xf32>
    %449 = arith.negf %448 : vector<8x32xf32>
    %450 = math.exp %449 : vector<8x32xf32>
    %cst_110 = arith.constant 1.000000e+00 : f32
    %451 = vector.broadcast %cst_110 : f32 to vector<8x32xf32>
    %452 = arith.addf %451, %450 : vector<8x32xf32>
    %453 = arith.divf %451, %452 : vector<8x32xf32>
    %454 = vector.extract_strided_slice %447 {offsets = [0, 32], sizes = [8, 32], strides = [1, 1]} : vector<8x128xf32> to vector<8x32xf32>
    %455 = arith.negf %454 : vector<8x32xf32>
    %456 = math.exp %455 : vector<8x32xf32>
    %cst_111 = arith.constant 1.000000e+00 : f32
    %457 = vector.broadcast %cst_111 : f32 to vector<8x32xf32>
    %458 = arith.addf %457, %456 : vector<8x32xf32>
    %459 = arith.divf %457, %458 : vector<8x32xf32>
    %460 = vector.extract_strided_slice %447 {offsets = [0, 64], sizes = [8, 32], strides = [1, 1]} : vector<8x128xf32> to vector<8x32xf32>
    %461 = math.tanh %460 : vector<8x32xf32>
    %462 = vector.extract_strided_slice %447 {offsets = [0, 96], sizes = [8, 32], strides = [1, 1]} : vector<8x128xf32> to vector<8x32xf32>
    %463 = arith.negf %462 : vector<8x32xf32>
    %464 = math.exp %463 : vector<8x32xf32>
    %cst_112 = arith.constant 1.000000e+00 : f32
    %465 = vector.broadcast %cst_112 : f32 to vector<8x32xf32>
    %466 = arith.addf %465, %464 : vector<8x32xf32>
    %467 = arith.divf %465, %466 : vector<8x32xf32>
    %468 = arith.mulf %459, %430 : vector<8x32xf32>
    %469 = arith.mulf %453, %461 : vector<8x32xf32>
    %470 = arith.addf %468, %469 : vector<8x32xf32>
    %471 = math.tanh %470 : vector<8x32xf32>
    %472 = arith.mulf %467, %471 : vector<8x32xf32>
    %473 = vector.broadcast %c4_i32_106 : i32 to vector<8x1xi32>
    %474 = arith.cmpi slt, %473, %1 : vector<8x1xi32>
    %475 = arith.extui %474 : vector<8x1xi1> to vector<8x1xi32>
    %476 = arith.sitofp %475 : vector<8x1xi32> to vector<8x1xf32>
    %477 = vector.broadcast %476 : vector<8x1xf32> to vector<8x32xf32>
    %478 = arith.mulf %472, %477 : vector<8x32xf32>
    %479 = arith.index_cast %442 : i32 to index
    %c0_113 = arith.constant 0 : index
    %480 = vector.load %arg9[%479, %c0_113] : memref<64x32xf32, #tpu.memory_space<vmem>>, vector<8x32xf32>
    tpu.vector_store %arg9[%479, %c0_113], %478 {strides = array<i32>} : memref<64x32xf32, #tpu.memory_space<vmem>>, vector<8x32xf32>,
    %c5_i32_114 = arith.constant 5 : i32
    %c8_i32_115 = arith.constant 8 : i32
    %481 = arith.muli %c5_i32_114, %c8_i32_115 : i32
    %482 = tpu.assume_multiple %481, 8 : i32
    %483 = arith.index_cast %482 : i32 to index
    %c0_116 = arith.constant 0 : index
    %484 = vector.load %arg10[%483, %c0_116] : memref<64x128xf32, #tpu.memory_space<vmem>>, vector<8x128xf32>
    %485 = arith.truncf %472 : vector<8x32xf32> to vector<8x32xbf16>
    %cst_117 = arith.constant dense<0.000000e+00> : vector<8x128xf32>
    %486 = tpu.matmul %485, %270, %cst_117 {dimension_numbers = #tpu.dot_dimension_numbers<[1], [0], [0], [1], [0, 0, 1, 1], [], []>} : vector<8x32xbf16>, vector<32x128xbf16>, vector<8x128xf32> -> vector<8x128xf32>
    %487 = arith.addf %484, %486 : vector<8x128xf32>
    %488 = vector.extract_strided_slice %487 {offsets = [0, 0], sizes = [8, 32], strides = [1, 1]} : vector<8x128xf32> to vector<8x32xf32>
    %489 = arith.negf %488 : vector<8x32xf32>
    %490 = math.exp %489 : vector<8x32xf32>
    %cst_118 = arith.constant 1.000000e+00 : f32
    %491 = vector.broadcast %cst_118 : f32 to vector<8x32xf32>
    %492 = arith.addf %491, %490 : vector<8x32xf32>
    %493 = arith.divf %491, %492 : vector<8x32xf32>
    %494 = vector.extract_strided_slice %487 {offsets = [0, 32], sizes = [8, 32], strides = [1, 1]} : vector<8x128xf32> to vector<8x32xf32>
    %495 = arith.negf %494 : vector<8x32xf32>
    %496 = math.exp %495 : vector<8x32xf32>
    %cst_119 = arith.constant 1.000000e+00 : f32
    %497 = vector.broadcast %cst_119 : f32 to vector<8x32xf32>
    %498 = arith.addf %497, %496 : vector<8x32xf32>
    %499 = arith.divf %497, %498 : vector<8x32xf32>
    %500 = vector.extract_strided_slice %487 {offsets = [0, 64], sizes = [8, 32], strides = [1, 1]} : vector<8x128xf32> to vector<8x32xf32>
    %501 = math.tanh %500 : vector<8x32xf32>
    %502 = vector.extract_strided_slice %487 {offsets = [0, 96], sizes = [8, 32], strides = [1, 1]} : vector<8x128xf32> to vector<8x32xf32>
    %503 = arith.negf %502 : vector<8x32xf32>
    %504 = math.exp %503 : vector<8x32xf32>
    %cst_120 = arith.constant 1.000000e+00 : f32
    %505 = vector.broadcast %cst_120 : f32 to vector<8x32xf32>
    %506 = arith.addf %505, %504 : vector<8x32xf32>
    %507 = arith.divf %505, %506 : vector<8x32xf32>
    %508 = arith.mulf %499, %470 : vector<8x32xf32>
    %509 = arith.mulf %493, %501 : vector<8x32xf32>
    %510 = arith.addf %508, %509 : vector<8x32xf32>
    %511 = math.tanh %510 : vector<8x32xf32>
    %512 = arith.mulf %507, %511 : vector<8x32xf32>
    %513 = vector.broadcast %c5_i32_114 : i32 to vector<8x1xi32>
    %514 = arith.cmpi slt, %513, %1 : vector<8x1xi32>
    %515 = arith.extui %514 : vector<8x1xi1> to vector<8x1xi32>
    %516 = arith.sitofp %515 : vector<8x1xi32> to vector<8x1xf32>
    %517 = vector.broadcast %516 : vector<8x1xf32> to vector<8x32xf32>
    %518 = arith.mulf %512, %517 : vector<8x32xf32>
    %519 = arith.index_cast %482 : i32 to index
    %c0_121 = arith.constant 0 : index
    %520 = vector.load %arg9[%519, %c0_121] : memref<64x32xf32, #tpu.memory_space<vmem>>, vector<8x32xf32>
    tpu.vector_store %arg9[%519, %c0_121], %518 {strides = array<i32>} : memref<64x32xf32, #tpu.memory_space<vmem>>, vector<8x32xf32>,
    %c6_i32_122 = arith.constant 6 : i32
    %c8_i32_123 = arith.constant 8 : i32
    %521 = arith.muli %c6_i32_122, %c8_i32_123 : i32
    %522 = tpu.assume_multiple %521, 8 : i32
    %523 = arith.index_cast %522 : i32 to index
    %c0_124 = arith.constant 0 : index
    %524 = vector.load %arg10[%523, %c0_124] : memref<64x128xf32, #tpu.memory_space<vmem>>, vector<8x128xf32>
    %525 = arith.truncf %512 : vector<8x32xf32> to vector<8x32xbf16>
    %cst_125 = arith.constant dense<0.000000e+00> : vector<8x128xf32>
    %526 = tpu.matmul %525, %270, %cst_125 {dimension_numbers = #tpu.dot_dimension_numbers<[1], [0], [0], [1], [0, 0, 1, 1], [], []>} : vector<8x32xbf16>, vector<32x128xbf16>, vector<8x128xf32> -> vector<8x128xf32>
    %527 = arith.addf %524, %526 : vector<8x128xf32>
    %528 = vector.extract_strided_slice %527 {offsets = [0, 0], sizes = [8, 32], strides = [1, 1]} : vector<8x128xf32> to vector<8x32xf32>
    %529 = arith.negf %528 : vector<8x32xf32>
    %530 = math.exp %529 : vector<8x32xf32>
    %cst_126 = arith.constant 1.000000e+00 : f32
    %531 = vector.broadcast %cst_126 : f32 to vector<8x32xf32>
    %532 = arith.addf %531, %530 : vector<8x32xf32>
    %533 = arith.divf %531, %532 : vector<8x32xf32>
    %534 = vector.extract_strided_slice %527 {offsets = [0, 32], sizes = [8, 32], strides = [1, 1]} : vector<8x128xf32> to vector<8x32xf32>
    %535 = arith.negf %534 : vector<8x32xf32>
    %536 = math.exp %535 : vector<8x32xf32>
    %cst_127 = arith.constant 1.000000e+00 : f32
    %537 = vector.broadcast %cst_127 : f32 to vector<8x32xf32>
    %538 = arith.addf %537, %536 : vector<8x32xf32>
    %539 = arith.divf %537, %538 : vector<8x32xf32>
    %540 = vector.extract_strided_slice %527 {offsets = [0, 64], sizes = [8, 32], strides = [1, 1]} : vector<8x128xf32> to vector<8x32xf32>
    %541 = math.tanh %540 : vector<8x32xf32>
    %542 = vector.extract_strided_slice %527 {offsets = [0, 96], sizes = [8, 32], strides = [1, 1]} : vector<8x128xf32> to vector<8x32xf32>
    %543 = arith.negf %542 : vector<8x32xf32>
    %544 = math.exp %543 : vector<8x32xf32>
    %cst_128 = arith.constant 1.000000e+00 : f32
    %545 = vector.broadcast %cst_128 : f32 to vector<8x32xf32>
    %546 = arith.addf %545, %544 : vector<8x32xf32>
    %547 = arith.divf %545, %546 : vector<8x32xf32>
    %548 = arith.mulf %539, %510 : vector<8x32xf32>
    %549 = arith.mulf %533, %541 : vector<8x32xf32>
    %550 = arith.addf %548, %549 : vector<8x32xf32>
    %551 = math.tanh %550 : vector<8x32xf32>
    %552 = arith.mulf %547, %551 : vector<8x32xf32>
    %553 = vector.broadcast %c6_i32_122 : i32 to vector<8x1xi32>
    %554 = arith.cmpi slt, %553, %1 : vector<8x1xi32>
    %555 = arith.extui %554 : vector<8x1xi1> to vector<8x1xi32>
    %556 = arith.sitofp %555 : vector<8x1xi32> to vector<8x1xf32>
    %557 = vector.broadcast %556 : vector<8x1xf32> to vector<8x32xf32>
    %558 = arith.mulf %552, %557 : vector<8x32xf32>
    %559 = arith.index_cast %522 : i32 to index
    %c0_129 = arith.constant 0 : index
    %560 = vector.load %arg9[%559, %c0_129] : memref<64x32xf32, #tpu.memory_space<vmem>>, vector<8x32xf32>
    tpu.vector_store %arg9[%559, %c0_129], %558 {strides = array<i32>} : memref<64x32xf32, #tpu.memory_space<vmem>>, vector<8x32xf32>,
    %c7_i32_130 = arith.constant 7 : i32
    %c8_i32_131 = arith.constant 8 : i32
    %561 = arith.muli %c7_i32_130, %c8_i32_131 : i32
    %562 = tpu.assume_multiple %561, 8 : i32
    %563 = arith.index_cast %562 : i32 to index
    %c0_132 = arith.constant 0 : index
    %564 = vector.load %arg10[%563, %c0_132] : memref<64x128xf32, #tpu.memory_space<vmem>>, vector<8x128xf32>
    %565 = arith.truncf %552 : vector<8x32xf32> to vector<8x32xbf16>
    %cst_133 = arith.constant dense<0.000000e+00> : vector<8x128xf32>
    %566 = tpu.matmul %565, %270, %cst_133 {dimension_numbers = #tpu.dot_dimension_numbers<[1], [0], [0], [1], [0, 0, 1, 1], [], []>} : vector<8x32xbf16>, vector<32x128xbf16>, vector<8x128xf32> -> vector<8x128xf32>
    %567 = arith.addf %564, %566 : vector<8x128xf32>
    %568 = vector.extract_strided_slice %567 {offsets = [0, 0], sizes = [8, 32], strides = [1, 1]} : vector<8x128xf32> to vector<8x32xf32>
    %569 = arith.negf %568 : vector<8x32xf32>
    %570 = math.exp %569 : vector<8x32xf32>
    %cst_134 = arith.constant 1.000000e+00 : f32
    %571 = vector.broadcast %cst_134 : f32 to vector<8x32xf32>
    %572 = arith.addf %571, %570 : vector<8x32xf32>
    %573 = arith.divf %571, %572 : vector<8x32xf32>
    %574 = vector.extract_strided_slice %567 {offsets = [0, 32], sizes = [8, 32], strides = [1, 1]} : vector<8x128xf32> to vector<8x32xf32>
    %575 = arith.negf %574 : vector<8x32xf32>
    %576 = math.exp %575 : vector<8x32xf32>
    %cst_135 = arith.constant 1.000000e+00 : f32
    %577 = vector.broadcast %cst_135 : f32 to vector<8x32xf32>
    %578 = arith.addf %577, %576 : vector<8x32xf32>
    %579 = arith.divf %577, %578 : vector<8x32xf32>
    %580 = vector.extract_strided_slice %567 {offsets = [0, 64], sizes = [8, 32], strides = [1, 1]} : vector<8x128xf32> to vector<8x32xf32>
    %581 = math.tanh %580 : vector<8x32xf32>
    %582 = vector.extract_strided_slice %567 {offsets = [0, 96], sizes = [8, 32], strides = [1, 1]} : vector<8x128xf32> to vector<8x32xf32>
    %583 = arith.negf %582 : vector<8x32xf32>
    %584 = math.exp %583 : vector<8x32xf32>
    %cst_136 = arith.constant 1.000000e+00 : f32
    %585 = vector.broadcast %cst_136 : f32 to vector<8x32xf32>
    %586 = arith.addf %585, %584 : vector<8x32xf32>
    %587 = arith.divf %585, %586 : vector<8x32xf32>
    %588 = arith.mulf %579, %550 : vector<8x32xf32>
    %589 = arith.mulf %573, %581 : vector<8x32xf32>
    %590 = arith.addf %588, %589 : vector<8x32xf32>
    %591 = math.tanh %590 : vector<8x32xf32>
    %592 = arith.mulf %587, %591 : vector<8x32xf32>
    %593 = vector.broadcast %c7_i32_130 : i32 to vector<8x1xi32>
    %594 = arith.cmpi slt, %593, %1 : vector<8x1xi32>
    %595 = arith.extui %594 : vector<8x1xi1> to vector<8x1xi32>
    %596 = arith.sitofp %595 : vector<8x1xi32> to vector<8x1xf32>
    %597 = vector.broadcast %596 : vector<8x1xf32> to vector<8x32xf32>
    %598 = arith.mulf %592, %597 : vector<8x32xf32>
    %599 = arith.index_cast %562 : i32 to index
    %c0_137 = arith.constant 0 : index
    %600 = vector.load %arg9[%599, %c0_137] : memref<64x32xf32, #tpu.memory_space<vmem>>, vector<8x32xf32>
    tpu.vector_store %arg9[%599, %c0_137], %598 {strides = array<i32>} : memref<64x32xf32, #tpu.memory_space<vmem>>, vector<8x32xf32>,
    %c8_i32_138 = arith.constant 8 : i32
    %c0_139 = arith.constant 0 : index
    %c0_140 = arith.constant 0 : index
    %601 = vector.load %arg9[%c0_139, %c0_140] : memref<64x32xf32, #tpu.memory_space<vmem>>, vector<64x32xf32>
    %602 = arith.truncf %601 : vector<64x32xf32> to vector<64x32xbf16>
    %c0_141 = arith.constant 0 : index
    %c0_142 = arith.constant 0 : index
    %603 = vector.load %arg5[%c0_141, %c0_142] : memref<32x16xbf16, #tpu.memory_space<vmem>>, vector<32x16xbf16>
    %cst_143 = arith.constant dense<0.000000e+00> : vector<64x16xf32>
    %604 = tpu.matmul %602, %603, %cst_143 {dimension_numbers = #tpu.dot_dimension_numbers<[1], [0], [0], [1], [0, 0, 1, 1], [], []>} : vector<64x32xbf16>, vector<32x16xbf16>, vector<64x16xf32> -> vector<64x16xf32>
    %c0_144 = arith.constant 0 : index
    %c0_145 = arith.constant 0 : index
    %605 = vector.load %arg6[%c0_144, %c0_145] : memref<1x16xf32, #tpu.memory_space<vmem>>, vector<1x16xf32>
    %606 = vector.broadcast %605 : vector<1x16xf32> to vector<64x16xf32>
    %607 = arith.addf %604, %606 : vector<64x16xf32>
    %608 = vector.extract_strided_slice %607 {offsets = [0, 0], sizes = [8, 16], strides = [1, 1]} : vector<64x16xf32> to vector<8x16xf32>
    %c0_146 = arith.constant 0 : index
    %c0_147 = arith.constant 0 : index
    %609 = vector.load %arg8[%c0_146, %c0_147] : memref<8x128xf32, #tpu.memory_space<vmem>>, vector<8x16xf32>
    tpu.vector_store %arg8[%c0_146, %c0_147], %608 {strides = array<i32>} : memref<8x128xf32, #tpu.memory_space<vmem>>, vector<8x16xf32>,
    %610 = vector.extract_strided_slice %607 {offsets = [8, 0], sizes = [8, 16], strides = [1, 1]} : vector<64x16xf32> to vector<8x16xf32>
    %c0_148 = arith.constant 0 : index
    %c16 = arith.constant 16 : index
    %611 = vector.load %arg8[%c0_148, %c16] : memref<8x128xf32, #tpu.memory_space<vmem>>, vector<8x16xf32>
    tpu.vector_store %arg8[%c0_148, %c16], %610 {strides = array<i32>} : memref<8x128xf32, #tpu.memory_space<vmem>>, vector<8x16xf32>,
    %612 = vector.extract_strided_slice %607 {offsets = [16, 0], sizes = [8, 16], strides = [1, 1]} : vector<64x16xf32> to vector<8x16xf32>
    %c0_149 = arith.constant 0 : index
    %c32 = arith.constant 32 : index
    %613 = vector.load %arg8[%c0_149, %c32] : memref<8x128xf32, #tpu.memory_space<vmem>>, vector<8x16xf32>
    tpu.vector_store %arg8[%c0_149, %c32], %612 {strides = array<i32>} : memref<8x128xf32, #tpu.memory_space<vmem>>, vector<8x16xf32>,
    %614 = vector.extract_strided_slice %607 {offsets = [24, 0], sizes = [8, 16], strides = [1, 1]} : vector<64x16xf32> to vector<8x16xf32>
    %c0_150 = arith.constant 0 : index
    %c48 = arith.constant 48 : index
    %615 = vector.load %arg8[%c0_150, %c48] : memref<8x128xf32, #tpu.memory_space<vmem>>, vector<8x16xf32>
    tpu.vector_store %arg8[%c0_150, %c48], %614 {strides = array<i32>} : memref<8x128xf32, #tpu.memory_space<vmem>>, vector<8x16xf32>,
    %616 = vector.extract_strided_slice %607 {offsets = [32, 0], sizes = [8, 16], strides = [1, 1]} : vector<64x16xf32> to vector<8x16xf32>
    %c0_151 = arith.constant 0 : index
    %c64 = arith.constant 64 : index
    %617 = vector.load %arg8[%c0_151, %c64] : memref<8x128xf32, #tpu.memory_space<vmem>>, vector<8x16xf32>
    tpu.vector_store %arg8[%c0_151, %c64], %616 {strides = array<i32>} : memref<8x128xf32, #tpu.memory_space<vmem>>, vector<8x16xf32>,
    %618 = vector.extract_strided_slice %607 {offsets = [40, 0], sizes = [8, 16], strides = [1, 1]} : vector<64x16xf32> to vector<8x16xf32>
    %c0_152 = arith.constant 0 : index
    %c80 = arith.constant 80 : index
    %619 = vector.load %arg8[%c0_152, %c80] : memref<8x128xf32, #tpu.memory_space<vmem>>, vector<8x16xf32>
    tpu.vector_store %arg8[%c0_152, %c80], %618 {strides = array<i32>} : memref<8x128xf32, #tpu.memory_space<vmem>>, vector<8x16xf32>,
    %620 = vector.extract_strided_slice %607 {offsets = [48, 0], sizes = [8, 16], strides = [1, 1]} : vector<64x16xf32> to vector<8x16xf32>
    %c0_153 = arith.constant 0 : index
    %c96 = arith.constant 96 : index
    %621 = vector.load %arg8[%c0_153, %c96] : memref<8x128xf32, #tpu.memory_space<vmem>>, vector<8x16xf32>
    tpu.vector_store %arg8[%c0_153, %c96], %620 {strides = array<i32>} : memref<8x128xf32, #tpu.memory_space<vmem>>, vector<8x16xf32>,
    %622 = vector.extract_strided_slice %607 {offsets = [56, 0], sizes = [8, 16], strides = [1, 1]} : vector<64x16xf32> to vector<8x16xf32>
    %c0_154 = arith.constant 0 : index
    %c112 = arith.constant 112 : index
    %623 = vector.load %arg8[%c0_154, %c112] : memref<8x128xf32, #tpu.memory_space<vmem>>, vector<8x16xf32>
    tpu.vector_store %arg8[%c0_154, %c112], %622 {strides = array<i32>} : memref<8x128xf32, #tpu.memory_space<vmem>>, vector<8x16xf32>,
    return
  }
  func.func @transform_0(%arg0: i32) -> (i32, i32) {
    %c0_i32 = arith.constant 0 : i32
    %c0_i32_0 = arith.constant 0 : i32
    return %arg0, %c0_i32 : i32, i32
  }
  func.func @transform_1(%arg0: i32) -> (i32, i32, i32) {
    %c0_i32 = arith.constant 0 : i32
    %c0_i32_0 = arith.constant 0 : i32
    %c0_i32_1 = arith.constant 0 : i32
    %c0_i32_2 = arith.constant 0 : i32
    return %c0_i32, %c0_i32_0, %c0_i32_1 : i32, i32, i32
  }
  func.func @transform_2(%arg0: i32) -> (i32, i32, i32) {
    %c0_i32 = arith.constant 0 : i32
    %c0_i32_0 = arith.constant 0 : i32
    %c0_i32_1 = arith.constant 0 : i32
    %c0_i32_2 = arith.constant 0 : i32
    return %c0_i32, %c0_i32_0, %c0_i32_1 : i32, i32, i32
  }
  func.func @transform_3(%arg0: i32) -> (i32, i32, i32) {
    %c0_i32 = arith.constant 0 : i32
    %c0_i32_0 = arith.constant 0 : i32
    %c0_i32_1 = arith.constant 0 : i32
    %c0_i32_2 = arith.constant 0 : i32
    return %c0_i32, %c0_i32_0, %c0_i32_1 : i32, i32, i32
  }
  func.func @transform_4(%arg0: i32) -> (i32, i32) {
    %c0_i32 = arith.constant 0 : i32
    %c0_i32_0 = arith.constant 0 : i32
    %c0_i32_1 = arith.constant 0 : i32
    return %c0_i32, %c0_i32_0 : i32, i32
  }
  func.func @transform_5(%arg0: i32) -> (i32, i32) {
    %c0_i32 = arith.constant 0 : i32
    %c0_i32_0 = arith.constant 0 : i32
    %c0_i32_1 = arith.constant 0 : i32
    return %c0_i32, %c0_i32_0 : i32, i32
  }
  func.func @transform_6(%arg0: i32) -> (i32, i32) {
    %c0_i32 = arith.constant 0 : i32
    %c0_i32_0 = arith.constant 0 : i32
    return %arg0, %c0_i32 : i32, i32
  }
  func.func @transform_7(%arg0: i32) -> (i32, i32) {
    %c0_i32 = arith.constant 0 : i32
    %c0_i32_0 = arith.constant 0 : i32
    return %arg0, %c0_i32 : i32, i32
  }
}

</mosaic_0001>

<bundles_post_ra>
// kernel: tpu_custom_call.1
= control target key start
LH: loop header
LB: loop body
LE: loop exit
PB: predicated region body
PF: predicated region fallthrough
CT: control target
= control target key end

     0   :  { %12 = vsyncpa [#allocation5], 0  ;;  %s2776_s0 = inlined_call_operand.hbm [shape: f32[8,32], index: 0, kind: input, shape index: {}]   ;;  %s2777_s1 = inlined_call_operand.vmem [shape: bf16[2,32,128], index: 1, kind: input, shape index: {}]   ;;  %s2778_s2 = inlined_call_operand.hbm [shape: bf16[2,32,128], index: 2, kind: input, shape index: {}]   ;;  %s2779_s3 = inlined_call_operand.hbm [shape: f32[2,1,128], index: 3, kind: input, shape index: {}]   ;;  %s2780_s4 = inlined_call_operand.vmem [shape: bf16[32,16], index: 4, kind: input, shape index: {}]   ;;  %s2781_s5 = inlined_call_operand.vmem [shape: f32[1,16], index: 5, kind: input, shape index: {}]   ;;  %s2782_s6 = inlined_call_operand.vmem [shape: s32[8,1], index: 6, kind: input, shape index: {}]   ;;  %s2783_s7 = inlined_call_operand.hbm [shape: f32[8,128], index: 7, kind: output, shape index: {}]  }
   0x1   :  { %13 = vsyncpa [#allocation8], 0 }
   0x2   :  { %14 = vsyncpa [#allocation6], 0  ;;  %s2328_s24 = smov [#allocation7]  }
   0x3   :  { %s32_s25 = sshll.u32 %s2328_s24, 4  ;;  %s33_s25 = int_to_ptr.vmem [resolvable:$true] %s32_s25 }
   0x4   :  { %s2250_s26 = scalar_lea.vmem %s33_s25, 512  ;;  %p2255_p1 = scmp.lt.s32.totalorder %s33_s25, %s33_s25 }
   0x5   :  { %p2251_p0 = scmp.ne.s32.totalorder %s33_s25, %s2250_s26  ;;  %p2256_p2 = scmp.lt.s32.totalorder %s2250_s26, %s2250_s26 }
   0x7   :  { %p2257_p3 = por %p2256_p2, %p2255_p1 }
   0x9   :  { %p2258_p4 = pnand %p2257_p3, %p2251_p0 }
   0xb   :  { %2261 = shalt.err (!%p2258_p4)
}
   0xc   :  { %s2329_s27 = smov 64   ;;  %s2330_s28 = smov 4  }
   0xd   :  { %38 = dma.hbm_to_vmem [thread:$0]  %s2778_s2, 512, %s33_s25, [#allocation8], %s2329_s27, %s2329_s27, %s2330_s28  }
   0xe   :  { %s2331_s8 = smov [#allocation4]   ;;  %s2332_s10 = smov [#allocation9]  }
   0xf   :  { %s21_s9 = sshll.u32 %s2331_s8, 4  ;;  %s44_s11 = sshll.u32 %s2332_s10, 4  ;;  %s22_s9 = int_to_ptr.vmem [resolvable:$true] %s21_s9  ;;  %s45_s11 = int_to_ptr.vmem [resolvable:$true] %s44_s11 }
  0x10   :  { %s2270_s12 = scalar_lea.vmem %s22_s9, 128  ;;  %p2275_p6 = scmp.lt.s32.totalorder %s22_s9, %s22_s9 }
  0x11   :  { %p2271_p5 = scmp.ne.s32.totalorder %s22_s9, %s2270_s12  ;;  %p2276_p7 = scmp.lt.s32.totalorder %s2270_s12, %s2270_s12 }
  0x13   :  { %p2277_p8 = por %p2276_p7, %p2275_p6 }
  0x15   :  { %p2278_p9 = pnand %p2277_p8, %p2271_p5 }
  0x17   :  { %2281 = shalt.err (!%p2278_p9)
}
  0x18   :  { %24 = dma.hbm_to_vmem [thread:$0]  %s2776_s0, 128, %s22_s9, [#allocation5]  }
  0x19   :  { %s2290_s15 = scalar_lea.vmem %s45_s11, 32  ;;  %p2295_p11 = scmp.lt.s32.totalorder %s45_s11, %s45_s11 }
  0x1a   :  { %p2291_p10 = scmp.ne.s32.totalorder %s45_s11, %s2290_s15  ;;  %p2296_p12 = scmp.lt.s32.totalorder %s2290_s15, %s2290_s15 }
  0x1c   :  { %p2297_p13 = por %p2296_p12, %p2295_p11 }
  0x1e   :  { %p2298_p0 = pnand %p2297_p13, %p2291_p10 }
  0x20   :  { %2301 = shalt.err (!%p2298_p0)
}
  0x21   :  { %s2333_s2 = smov 16   ;;  %s2334_s16 = smov 1  }
  0x22   :  { %50 = dma.hbm_to_vmem [thread:$0]  %s2779_s3, 32, %s45_s11, [#allocation8], %s2333_s2, %s2333_s2, %s2334_s16  }
  0x23   :  { %2322 = dma.done.wait [#allocation5], 128  }
  0x24   :  { %2323 = vsyncadd [#allocation5], 4294967168 }
  0x25   :  { %2324 = dma.done.wait [#allocation8], 544  }
  0x26   :  { %2325 = vsyncadd [#allocation8], 4294966752  ;;  %v2335_v0 = vmov 0.0   ;;  %vm2336_vm0 = vmmov 0   ;;  %v2337_v1 = vmov 0   ;;  %v2104_v2 = vld [vmem:[%s2777_s1 + $0x8] sm:$0xff]  }
  0x27   :  { %1906 = vmatprep.subr.bf16.mxu0 %v2335_v0  ;;  %1914 = vmatprep.subr.bf16.mxu1 %v2335_v0  ;;  %v2408_v3 = vld [vmem:[#allocation7 + $0x8] sm:$0xff]   ;;  %v2106_v4 = vld [vmem:[%s2777_s1] sm:$0xff]   ;;  %v2415_v5 = vld [vmem:[#allocation7] sm:$0xff]   ;;  %vm97_vm1 = vcmask 261120   ;;  %s2338_s21 = smov 32   ;;  %vm1719_vm10 = vcmask 130048  }
  0x28   :  { %1910 = vmatprep.mubr.msk.bf16.mxu0 %vm2336_vm0, %v2335_v0  ;;  %1918 = vmatprep.mubr.msk.bf16.mxu1 %vm2336_vm0, %v2335_v0  ;;  %v72_v6 = vld [vmem:[#allocation4] sm:$0xff]  ;;  %v1779_v8 = vld [vmem:[#allocation9] ss:$0 sm:$0xff]  ;;  %s2339_s9 = smov 48   ;;  %s2341_s10 = smov 96   ;;  %vm1725_vm11 = vcmask 261248  }
  0x29   :  { %2082 = vset.pattern.permute.xlu1 %v2337_v1  ;;  %2088 = vset.pattern.permute.xlu0 %v2337_v1  ;;  %v73_v7 = vpack.c.bf16 %v72_v6, %v72_v6  ;;  %vm1731_vm12 = vcmask 392448   ;;  %s2342_s11 = smov 112   ;;  %vm1737_vm13 = vcmask 523648   ;;  %vm1743_vm14 = vcmask 654848  }
  0x2a   :  { %1907 = vmatpush3.bf16.msra.mxu0 %v2104_v2  ;;  %1915 = vmatpush3.bf16.msra.mxu1 %v2408_v3  ;;  %vm1749_vm15 = vcmask 786048  }
  0x2b   :  { %1908 = vmatprep.subr.bf16.mxu0 %v2335_v0  ;;  %1916 = vmatprep.subr.bf16.mxu1 %v2335_v0 }
  0x2e   :  { %1909 = vmatpush3.bf16.msra.mxu0 %v2106_v4  ;;  %1917 = vmatpush3.bf16.msra.mxu1 %v2415_v5 }
  0x2f   :  { %1922 = vmatprep.subr.bf16.mxu0 %v2335_v0  ;;  %1930 = vmatprep.subr.bf16.mxu1 %v2335_v0 }
  0x31   :  { %1911 = vmatmul.mubr.msk.bf16.vlgmr.msra.gmra.mxu0 %vm97_vm1, %v73_v7  ;;  %1919 = vmatmul.mubr.bf16.vlgmr.msra.gmra.mxu1 %v2337_v1 }
  0x32   :  { %1923 = vmatpush3.bf16.msra.mxu0 %v2408_v3  ;;  %1926 = vmatprep.mubr.msk.bf16.mxu0 %vm2336_vm0, %v2335_v0 }
  0x33   :  { %1924 = vmatprep.subr.bf16.mxu0 %v2335_v0  ;;  %1931 = vmatpush3.bf16.msra.mxu1 %v2408_v3 }
  0x34   :  { %1934 = vmatprep.mubr.msk.bf16.mxu1 %vm2336_vm0, %v2335_v0  ;;  %1932 = vmatprep.subr.bf16.mxu1 %v2335_v0 }
  0x36   :  { %1925 = vmatpush3.bf16.msra.mxu0 %v2415_v5 }
  0x37   :  { %1938 = vmatprep.subr.bf16.mxu0 %v2335_v0  ;;  %1933 = vmatpush3.bf16.msra.mxu1 %v2415_v5 }
  0x38   :  { %1946 = vmatprep.subr.bf16.mxu1 %v2335_v0 }
  0xf1   :  { %v135_v9 = vpop.f32.mrf.mxu0  ;;  %v190_v11 = vpop.f32.mrf.mxu1 }
  0xf2   :  { %v2435_v10 = vadd.f32 %v1779_v8, %v135_v9 }
  0xf3   :  { %v1912_v12 = vpop.f32.mrf.mxu0  ;;  %v1920_v14 = vpop.f32.mrf.mxu1 }
  0xf4   :  { %v196_v13 = vadd.f32 %v190_v11, %v2435_v10 }
  0xf5   :  { %v138_v15 = vpop.f32.mrf.mxu0  ;;  %v193_v16 = vpop.f32.mrf.mxu1 }
  0xf6   :  { %2114 = vtanh.f32 %v196_v13  ;;  %v1785_v20 = vmul.f32 -1.442695, %v196_v13 }
  0xf7   :  { %v1913_v17 = vpop.f32.mrf.mxu0  ;;  %v1921_v18 = vpop.f32.mrf.mxu1 }
  0xf8   :  { %2116 = vpow2.f32 %v1785_v20 }
 0x103   :  { %v2115_v19 = vpop.eup %2114 }
 0x104   :  { %206 = vrot.lane.b32.xlu0 %v2115_v19, %s2329_s27 }
 0x105   :  { %v2117_v21 = vpop.eup %2116 }
 0x106   :  { %v200_v22 = vadd.f32 1.0, %v2117_v21 }
 0x108   :  { %2118 = vrcp.f32 %v200_v22 }
 0x115   :  { %v2119_v23 = vpop.eup %2118 }
 0x116   :  { %v204_v26 = vmul.f32 0.0, %v2119_v23 }
 0x176   :  { %v207_v24 = vpop.permute.xlu0 %206 }
 0x177   :  { %v209_v25 = vmul.f32 %v2119_v23, %v207_v24 }
 0x179   :  { %211 = vrot.lane.b32.xlu0 %v209_v25, %s2338_s21 }
 0x1eb   :  { %v212_v27 = vpop.permute.xlu0 %211 }
 0x1ec   :  { %v214_v28 = vadd.f32 %v212_v27, %v204_v26 }
 0x1ee   :  { %2120 = vtanh.f32 %v214_v28 }
 0x1fb   :  { %v2121_v29 = vpop.eup %2120 }
 0x1fc   :  { %217 = vrot.lane.b32.xlu1 %v2121_v29, %s2329_s27 }
 0x26e   :  { %v218_v30 = vpop.permute.xlu1 %217 }
 0x26f   :  { %v2441_v31 = vmul.f32 %v2119_v23, %v218_v30 }
 0x271   :  { %v226_v32 = vpack.c.bf16 %v2441_v31, %v2441_v31 }
 0x273   :  { %228 = vrot.lane.b32.xlu1 %v226_v32, %s2338_s21 }
 0x2e5   :  { %v229_v33 = vpop.permute.xlu1 %228 }
 0x2e6   :  { %1927 = vmatmul.mubr.msk.bf16.vlgmr.msra.gmra.mxu0 %vm97_vm1, %v229_v33 }
 0x2e7   :  { %1939 = vmatpush3.bf16.msra.mxu0 %v2408_v3  ;;  %1942 = vmatprep.mubr.msk.bf16.mxu0 %vm2336_vm0, %v2335_v0 }
 0x2e8   :  { %1940 = vmatprep.subr.bf16.mxu0 %v2335_v0 }
 0x2eb   :  { %1941 = vmatpush3.bf16.msra.mxu0 %v2415_v5 }
 0x2ec   :  { %1954 = vmatprep.subr.bf16.mxu0 %v2335_v0 }
 0x3a6   :  { %v267_v34 = vpop.f32.mrf.mxu0 }
 0x3a7   :  { %v273_v35 = vadd.f32 %v267_v34, %v2435_v10 }
 0x3a8   :  { %v1928_v36 = vpop.f32.mrf.mxu0 }
 0x3a9   :  { %2122 = vtanh.f32 %v273_v35  ;;  %v1787_v40 = vmul.f32 -1.442695, %v273_v35 }
 0x3aa   :  { %v270_v37 = vpop.f32.mrf.mxu0 }
 0x3ab   :  { %2124 = vpow2.f32 %v1787_v40 }
 0x3ac   :  { %v1929_v38 = vpop.f32.mrf.mxu0 }
 0x3b6   :  { %v2123_v39 = vpop.eup %2122 }
 0x3b7   :  { %283 = vrot.lane.b32.xlu0 %v2123_v39, %s2329_s27 }
 0x3b8   :  { %v2125_v41 = vpop.eup %2124 }
 0x3b9   :  { %v277_v42 = vadd.f32 1.0, %v2125_v41 }
 0x3bb   :  { %2126 = vrcp.f32 %v277_v42 }
 0x3c8   :  { %v2127_v43 = vpop.eup %2126 }
 0x3c9   :  { %v281_v46 = vmul.f32 %v2127_v43, %v214_v28 }
 0x429   :  { %v284_v44 = vpop.permute.xlu0 %283 }
 0x42a   :  { %v286_v45 = vmul.f32 %v2127_v43, %v284_v44 }
 0x42c   :  { %288 = vrot.lane.b32.xlu1 %v286_v45, %s2338_s21 }
 0x49e   :  { %v289_v47 = vpop.permute.xlu1 %288 }
 0x49f   :  { %v291_v48 = vadd.f32 %v289_v47, %v281_v46 }
 0x4a1   :  { %2128 = vtanh.f32 %v291_v48 }
 0x4ae   :  { %v2129_v49 = vpop.eup %2128 }
 0x4af   :  { %294 = vrot.lane.b32.xlu0 %v2129_v49, %s2329_s27 }
 0x521   :  { %v295_v50 = vpop.permute.xlu0 %294 }
 0x522   :  { %v2457_v51 = vmul.f32 %v2127_v43, %v295_v50 }
 0x524   :  { %v304_v52 = vpack.c.bf16 %v2457_v51, %v2457_v51 }
 0x526   :  { %306 = vrot.lane.b32.xlu1 %v304_v52, %s2338_s21 }
 0x598   :  { %v307_v53 = vpop.permute.xlu1 %306 }
 0x599   :  { %1935 = vmatmul.mubr.msk.bf16.vlgmr.msra.gmra.mxu1 %vm97_vm1, %v307_v53 }
 0x59a   :  { %1947 = vmatpush3.bf16.msra.mxu1 %v2408_v3  ;;  %1950 = vmatprep.mubr.msk.bf16.mxu1 %vm2336_vm0, %v2335_v0 }
 0x59b   :  { %1948 = vmatprep.subr.bf16.mxu1 %v2335_v0 }
 0x59e   :  { %1949 = vmatpush3.bf16.msra.mxu1 %v2415_v5 }
 0x59f   :  { %1962 = vmatprep.subr.bf16.mxu1 %v2335_v0 }
 0x659   :  { %v345_v54 = vpop.f32.mrf.mxu1 }
 0x65a   :  { %v351_v55 = vadd.f32 %v345_v54, %v2435_v10 }
 0x65b   :  { %v1936_v56 = vpop.f32.mrf.mxu1 }
 0x65c   :  { %2130 = vtanh.f32 %v351_v55  ;;  %v1789_v60 = vmul.f32 -1.442695, %v351_v55 }
 0x65d   :  { %v348_v57 = vpop.f32.mrf.mxu1 }
 0x65e   :  { %2132 = vpow2.f32 %v1789_v60 }
 0x65f   :  { %v1937_v58 = vpop.f32.mrf.mxu1 }
 0x669   :  { %v2131_v59 = vpop.eup %2130 }
 0x66a   :  { %361 = vrot.lane.b32.xlu0 %v2131_v59, %s2329_s27 }
 0x66b   :  { %v2133_v61 = vpop.eup %2132 }
 0x66c   :  { %v355_v62 = vadd.f32 1.0, %v2133_v61 }
 0x66e   :  { %2134 = vrcp.f32 %v355_v62 }
 0x67b   :  { %v2135_v63 = vpop.eup %2134 }
 0x67c   :  { %v359_v6 = vmul.f32 %v2135_v63, %v291_v48 }
 0x6dc   :  { %v362_v2 = vpop.permute.xlu0 %361 }
 0x6dd   :  { %v364_v4 = vmul.f32 %v2135_v63, %v362_v2 }
 0x6df   :  { %366 = vrot.lane.b32.xlu1 %v364_v4, %s2338_s21 }
 0x751   :  { %v367_v7 = vpop.permute.xlu1 %366 }
 0x752   :  { %v369_v8 = vadd.f32 %v367_v7, %v359_v6 }
 0x754   :  { %2136 = vtanh.f32 %v369_v8 }
 0x761   :  { %v2137_v9 = vpop.eup %2136 }
 0x762   :  { %372 = vrot.lane.b32.xlu0 %v2137_v9, %s2329_s27 }
 0x7d4   :  { %v373_v11 = vpop.permute.xlu0 %372 }
 0x7d5   :  { %v2473_v12 = vmul.f32 %v2135_v63, %v373_v11 }
 0x7d7   :  { %v382_v13 = vpack.c.bf16 %v2473_v12, %v2473_v12 }
 0x7d9   :  { %384 = vrot.lane.b32.xlu1 %v382_v13, %s2338_s21 }
 0x84b   :  { %v385_v14 = vpop.permute.xlu1 %384 }
 0x84c   :  { %1943 = vmatmul.mubr.msk.bf16.vlgmr.msra.gmra.mxu0 %vm97_vm1, %v385_v14 }
 0x84d   :  { %1955 = vmatpush3.bf16.msra.mxu0 %v2408_v3  ;;  %1958 = vmatprep.mubr.msk.bf16.mxu0 %vm2336_vm0, %v2335_v0 }
 0x84e   :  { %1956 = vmatprep.subr.bf16.mxu0 %v2335_v0 }
 0x851   :  { %1957 = vmatpush3.bf16.msra.mxu0 %v2415_v5 }
 0x852   :  { %1970 = vmatprep.subr.bf16.mxu0 %v2335_v0 }
 0x90c   :  { %v423_v15 = vpop.f32.mrf.mxu0 }
 0x90d   :  { %v429_v16 = vadd.f32 %v423_v15, %v2435_v10 }
 0x90e   :  { %v1944_v17 = vpop.f32.mrf.mxu0 }
 0x90f   :  { %2138 = vtanh.f32 %v429_v16  ;;  %v1791_v21 = vmul.f32 -1.442695, %v429_v16 }
 0x910   :  { %v426_v18 = vpop.f32.mrf.mxu0 }
 0x911   :  { %2140 = vpow2.f32 %v1791_v21 }
 0x912   :  { %v1945_v19 = vpop.f32.mrf.mxu0 }
 0x91c   :  { %v2139_v20 = vpop.eup %2138 }
 0x91d   :  { %439 = vrot.lane.b32.xlu0 %v2139_v20, %s2329_s27 }
 0x91e   :  { %v2141_v22 = vpop.eup %2140 }
 0x91f   :  { %v433_v23 = vadd.f32 1.0, %v2141_v22 }
 0x921   :  { %2142 = vrcp.f32 %v433_v23 }
 0x92e   :  { %v2143_v24 = vpop.eup %2142 }
 0x92f   :  { %v437_v27 = vmul.f32 %v2143_v24, %v369_v8 }
 0x98f   :  { %v440_v25 = vpop.permute.xlu0 %439 }
 0x990   :  { %v442_v26 = vmul.f32 %v2143_v24, %v440_v25 }
 0x992   :  { %444 = vrot.lane.b32.xlu1 %v442_v26, %s2338_s21 }
 0xa04   :  { %v445_v28 = vpop.permute.xlu1 %444 }
 0xa05   :  { %v447_v29 = vadd.f32 %v445_v28, %v437_v27 }
 0xa07   :  { %2144 = vtanh.f32 %v447_v29 }
 0xa14   :  { %v2145_v30 = vpop.eup %2144 }
 0xa15   :  { %450 = vrot.lane.b32.xlu0 %v2145_v30, %s2329_s27 }
 0xa87   :  { %v451_v32 = vpop.permute.xlu0 %450 }
 0xa88   :  { %v2489_v33 = vmul.f32 %v2143_v24, %v451_v32 }
 0xa8a   :  { %v460_v34 = vpack.c.bf16 %v2489_v33, %v2489_v33 }
 0xa8c   :  { %462 = vrot.lane.b32.xlu1 %v460_v34, %s2338_s21 }
 0xafe   :  { %v463_v35 = vpop.permute.xlu1 %462 }
 0xaff   :  { %1951 = vmatmul.mubr.msk.bf16.vlgmr.msra.gmra.mxu1 %vm97_vm1, %v463_v35 }
 0xb00   :  { %1963 = vmatpush3.bf16.msra.mxu1 %v2408_v3  ;;  %1966 = vmatprep.mubr.msk.bf16.mxu1 %vm2336_vm0, %v2335_v0 }
 0xb01   :  { %1964 = vmatprep.subr.bf16.mxu1 %v2335_v0 }
 0xb04   :  { %1965 = vmatpush3.bf16.msra.mxu1 %v2415_v5 }
 0xbbf   :  { %v501_v36 = vpop.f32.mrf.mxu1 }
 0xbc0   :  { %v507_v37 = vadd.f32 %v501_v36, %v2435_v10  ;;  %v2108_v36 = vld [vmem:[%s2777_s1 + $0x18] sm:$0xff]  }
 0xbc1   :  { %v1952_v38 = vpop.f32.mrf.mxu1  ;;  %1978 = vmatprep.subr.bf16.mxu1 %v2108_v36 }
 0xbc2   :  { %2146 = vtanh.f32 %v507_v37  ;;  %v1793_v42 = vmul.f32 -1.442695, %v507_v37 }
 0xbc3   :  { %v504_v39 = vpop.f32.mrf.mxu1 }
 0xbc4   :  { %2148 = vpow2.f32 %v1793_v42 }
 0xbc5   :  { %v1953_v40 = vpop.f32.mrf.mxu1 }
 0xbcf   :  { %v2147_v41 = vpop.eup %2146 }
 0xbd0   :  { %517 = vrot.lane.b32.xlu0 %v2147_v41, %s2329_s27 }
 0xbd1   :  { %v2149_v43 = vpop.eup %2148 }
 0xbd2   :  { %v511_v44 = vadd.f32 1.0, %v2149_v43 }
 0xbd4   :  { %2150 = vrcp.f32 %v511_v44 }
 0xbe1   :  { %v2151_v45 = vpop.eup %2150 }
 0xbe2   :  { %v515_v48 = vmul.f32 %v2151_v45, %v447_v29 }
 0xc42   :  { %v518_v46 = vpop.permute.xlu0 %517 }
 0xc43   :  { %v520_v47 = vmul.f32 %v2151_v45, %v518_v46  ;;  %v2558_v46 = vld [vmem:[#allocation7 + $0x18] sm:$0xff]  }
 0xc45   :  { %522 = vrot.lane.b32.xlu1 %v520_v47, %s2338_s21  ;;  %v2563_v47 = vld [vmem:[#allocation7 + $0x10] sm:$0xff]  }
 0xcb7   :  { %v523_v49 = vpop.permute.xlu1 %522 }
 0xcb8   :  { %v525_v50 = vadd.f32 %v523_v49, %v515_v48 }
 0xcba   :  { %2152 = vtanh.f32 %v525_v50 }
 0xcc7   :  { %v2153_v52 = vpop.eup %2152 }
 0xcc8   :  { %528 = vrot.lane.b32.xlu0 %v2153_v52, %s2329_s27 }
 0xd3a   :  { %v529_v53 = vpop.permute.xlu0 %528 }
 0xd3b   :  { %v2504_v54 = vmul.f32 %v2151_v45, %v529_v53 }
 0xd3d   :  { %v538_v55 = vpack.c.bf16 %v2504_v54, %v2504_v54 }
 0xd3f   :  { %540 = vrot.lane.b32.xlu1 %v538_v55, %s2338_s21 }
 0xdb1   :  { %v541_v56 = vpop.permute.xlu1 %540 }
 0xdb2   :  { %1959 = vmatmul.mubr.msk.bf16.vlgmr.msra.gmra.mxu0 %vm97_vm1, %v541_v56  ;;  %v2583_v56 = vld [vmem:[#allocation9 + $0x1] ss:$0 sm:$0xff] }
 0xdb3   :  { %1971 = vmatpush3.bf16.msra.mxu0 %v2408_v3  ;;  %1974 = vmatprep.mubr.msk.bf16.mxu0 %vm2336_vm0, %v2335_v0 }
 0xdb4   :  { %1972 = vmatprep.subr.bf16.mxu0 %v2335_v0 }
 0xdb7   :  { %1973 = vmatpush3.bf16.msra.mxu0 %v2415_v5 }
 0xdb8   :  { %1990 = vmatprep.subr.bf16.mxu0 %v2335_v0 }
 0xe72   :  { %v579_v57 = vpop.f32.mrf.mxu0 }
 0xe73   :  { %v585_v58 = vadd.f32 %v579_v57, %v2435_v10 }
 0xe74   :  { %v1960_v59 = vpop.f32.mrf.mxu0 }
 0xe75   :  { %2154 = vtanh.f32 %v585_v58  ;;  %v1795_v3 = vmul.f32 -1.442695, %v585_v58 }
 0xe76   :  { %v582_v60 = vpop.f32.mrf.mxu0 }
 0xe77   :  { %2156 = vpow2.f32 %v1795_v3 }
 0xe78   :  { %v1961_v61 = vpop.f32.mrf.mxu0 }
 0xe82   :  { %v2155_v62 = vpop.eup %2154 }
 0xe83   :  { %595 = vrot.lane.b32.xlu0 %v2155_v62, %s2329_s27 }
 0xe84   :  { %v2157_v63 = vpop.eup %2156 }
 0xe85   :  { %v589_v2 = vadd.f32 1.0, %v2157_v63 }
 0xe87   :  { %2158 = vrcp.f32 %v589_v2 }
 0xe94   :  { %v2159_v4 = vpop.eup %2158 }
 0xe95   :  { %v593_v7 = vmul.f32 %v2159_v4, %v525_v50 }
 0xef5   :  { %v596_v6 = vpop.permute.xlu0 %595 }
 0xef6   :  { %v598_v5 = vmul.f32 %v2159_v4, %v596_v6 }
 0xef8   :  { %600 = vrot.lane.b32.xlu1 %v598_v5, %s2338_s21 }
 0xf6a   :  { %v601_v8 = vpop.permute.xlu1 %600 }
 0xf6b   :  { %v603_v9 = vadd.f32 %v601_v8, %v593_v7 }
 0xf6d   :  { %2160 = vtanh.f32 %v603_v9 }
 0xf7a   :  { %v2161_v11 = vpop.eup %2160 }
 0xf7b   :  { %606 = vrot.lane.b32.xlu0 %v2161_v11, %s2329_s27 }
 0xfed   :  { %v607_v13 = vpop.permute.xlu0 %606 }
 0xfee   :  { %v2520_v14 = vmul.f32 %v2159_v4, %v607_v13 }
 0xff0   :  { %v616_v15 = vpack.c.bf16 %v2520_v14, %v2520_v14 }
 0xff2   :  { %618 = vrot.lane.b32.xlu1 %v616_v15, %s2338_s21 }
0x1064   :  { %v619_v16 = vpop.permute.xlu1 %618 }
0x1065   :  { %1967 = vmatmul.mubr.msk.bf16.vlgmr.msra.gmra.mxu1 %vm97_vm1, %v619_v16 }
0x1066   :  { %1979 = vmatpush3.bf16.msra.mxu1 %v2108_v36 }
0x1125   :  { %v657_v17 = vpop.f32.mrf.mxu1 }
0x1126   :  { %v663_v18 = vadd.f32 %v657_v17, %v2435_v10 }
0x1127   :  { %v1968_v19 = vpop.f32.mrf.mxu1 }
0x1128   :  { %2162 = vtanh.f32 %v663_v18  ;;  %v1797_v23 = vmul.f32 -1.442695, %v663_v18 }
0x1129   :  { %v660_v20 = vpop.f32.mrf.mxu1 }
0x112a   :  { %2164 = vpow2.f32 %v1797_v23 }
0x112b   :  { %v1969_v21 = vpop.f32.mrf.mxu1 }
0x1135   :  { %v2163_v22 = vpop.eup %2162 }
0x1136   :  { %673 = vrot.lane.b32.xlu0 %v2163_v22, %s2329_s27 }
0x1137   :  { %v2165_v24 = vpop.eup %2164 }
0x1138   :  { %v667_v25 = vadd.f32 1.0, %v2165_v24 }
0x113a   :  { %2166 = vrcp.f32 %v667_v25 }
0x1147   :  { %v2167_v26 = vpop.eup %2166 }
0x1148   :  { %v671_v29 = vmul.f32 %v2167_v26, %v603_v9 }
0x11a8   :  { %v674_v27 = vpop.permute.xlu0 %673 }
0x11a9   :  { %v676_v28 = vmul.f32 %v2167_v26, %v674_v27 }
0x11ab   :  { %678 = vrot.lane.b32.xlu1 %v676_v28, %s2338_s21 }
0x11af   :  { %222 = vrot.lane.b32.xlu1 %v2441_v31, %s2338_s21  ;;  %v2109_v31 = vld [vmem:[%s2777_s1 + $0x10] sm:$0xff]  }
0x11b0   :  { %1980 = vmatprep.subr.bf16.mxu1 %v2109_v31 }
0x11b1   :  { %1981 = vmatpush3.bf16.msra.mxu1 %v2109_v31 }
0x11b2   :  { %2006 = vmatprep.subr.bf16.mxu1 %v2335_v0 }
0x11b3   :  { %377 = vrot.lane.b32.xlu1 %v2473_v12, %s2338_s21 }
0x121d   :  { %v679_v30 = vpop.permute.xlu1 %678 }
0x121e   :  { %v2533_v32 = vadd.f32 %v679_v30, %v671_v29 }
0x1220   :  { %2168 = vtanh.f32 %v2533_v32 }
0x1221   :  { %v223_v34 = vpop.permute.xlu1 %222 }
0x1222   :  { %225 = vst.msk [vmem:[#allocation2] sm:$0xff] %vm97_vm1, %v223_v34 }
0x1225   :  { %v378_v35 = vpop.permute.xlu1 %377 }
0x1226   :  { %381 = vst.msk [vmem:[#allocation2 + $0x10] sm:$0xff] %vm97_vm1, %v378_v35 }
0x1229   :  { %v777_v42 = vld [vmem:[#allocation2] sm:$0xff] }
0x122d   :  { %v2169_v12 = vpop.eup %2168 }
0x122e   :  { %684 = vrot.lane.b32.xlu0 %v2169_v12, %s2329_s27 }
0x1232   :  { %299 = vrot.lane.b32.xlu0 %v2457_v51, %s2338_s21 }
0x1236   :  { %455 = vrot.lane.b32.xlu0 %v2489_v33, %s2338_s21  ;;  %v779_v33 = vld [vmem:[#allocation2 + $0x10] sm:$0xff] }
0x12a0   :  { %v685_v37 = vpop.permute.xlu0 %684 }
0x12a1   :  { %v2550_v38 = vmul.f32 %v2167_v26, %v685_v37 }
0x12a3   :  { %v694_v39 = vpack.c.bf16 %v2550_v38, %v2550_v38 }
0x12a4   :  { %v300_v40 = vpop.permute.xlu0 %299 }
0x12a5   :  { %303 = vst.msk [vmem:[#allocation2 + $0x8] sm:$0xff] %vm97_vm1, %v300_v40  ;;  %696 = vrot.lane.b32.xlu1 %v694_v39, %s2338_s21 }
0x12a8   :  { %v456_v41 = vpop.permute.xlu0 %455 }
0x12a9   :  { %459 = vst.msk [vmem:[#allocation2 + $0x18] sm:$0xff] %vm97_vm1, %v456_v41 }
0x12ac   :  { %v778_v43 = vld [vmem:[#allocation2 + $0x8] sm:$0xff] }
0x12ad   :  { %v785_v51 = vpack.c.bf16 %v778_v43, %v777_v42 }
0x12af   :  { %1982 = vmatprep.mubr.msk.bf16.mxu1 %vm97_vm1, %v785_v51 }
0x12b0   :  { %v780_v44 = vld [vmem:[#allocation2 + $0x18] sm:$0xff] }
0x12b1   :  { %v786_v45 = vpack.c.bf16 %v780_v44, %v779_v33 }
0x12b3   :  { %1983 = vmatmul.mubr.msk.bf16.vlgmr.msra.gmra.mxu1 %vm97_vm1, %v786_v45 }
0x12b4   :  { %2007 = vmatpush3.bf16.msra.mxu1 %v2558_v46 }
0x12b5   :  { %2008 = vmatprep.subr.bf16.mxu1 %v2335_v0 }
0x12b8   :  { %2009 = vmatpush3.bf16.msra.mxu1 %v2563_v47 }
0x12b9   :  { %2022 = vmatprep.subr.bf16.mxu1 %v2335_v0 }
0x1317   :  { %v697_v48 = vpop.permute.xlu1 %696 }
0x1318   :  { %1975 = vmatmul.mubr.msk.bf16.vlgmr.msra.gmra.mxu0 %vm97_vm1, %v697_v48 }
0x1319   :  { %1991 = vmatpush3.bf16.msra.mxu0 %v2558_v46  ;;  %1994 = vmatprep.mubr.msk.bf16.mxu0 %vm2336_vm0, %v2335_v0 }
0x131a   :  { %1992 = vmatprep.subr.bf16.mxu0 %v2335_v0 }
0x131d   :  { %1993 = vmatpush3.bf16.msra.mxu0 %v2563_v47 }
0x131e   :  { %1998 = vmatprep.subr.bf16.mxu0 %v2335_v0 }
0x1320   :  { %1995 = vmatmul.mubr.bf16.vlgmr.msra.gmra.mxu0 %v2337_v1 }
0x1321   :  { %1999 = vmatpush3.bf16.msra.mxu0 %v2558_v46  ;;  %2002 = vmatprep.mubr.msk.bf16.mxu0 %vm2336_vm0, %v2335_v0 }
0x1322   :  { %2000 = vmatprep.subr.bf16.mxu0 %v2335_v0 }
0x1325   :  { %2001 = vmatpush3.bf16.msra.mxu0 %v2563_v47 }
0x1326   :  { %2014 = vmatprep.subr.bf16.mxu0 %v2335_v0 }
0x1373   :  { %v2581_v49 = vpop.f32.mrf.mxu1 }
0x1375   :  { %v860_v53 = vpop.f32.mrf.mxu1 }
0x1376   :  { %v861_v57 = vadd.f32 %v2583_v56, %v860_v53 }
0x1377   :  { %v2612_v35 = vpop.f32.mrf.mxu1 }
0x1379   :  { %v863_v36 = vpop.f32.mrf.mxu1 }
0x137a   :  { %v864_v31 = vadd.f32 %v2583_v56, %v863_v36 }
0x13d8   :  { %v735_v50 = vpop.f32.mrf.mxu0 }
0x13d9   :  { %v741_v13 = vadd.f32 %v735_v50, %v2435_v10 }
0x13da   :  { %v1976_v52 = vpop.f32.mrf.mxu0 }
0x13db   :  { %v1799_v17 = vmul.f32 -1.442695, %v741_v13 }
0x13dc   :  { %v738_v55 = vpop.f32.mrf.mxu0 }
0x13de   :  { %v1977_v1 = vpop.f32.mrf.mxu0 }
0x13e0   :  { %v946_v58 = vpop.f32.mrf.mxu0 }
0x13e1   :  { %v952_v59 = vadd.f32 %v946_v58, %v861_v57 }
0x13e2   :  { %v1996_v60 = vpop.f32.mrf.mxu0 }
0x13e3   :  { %2170 = vtanh.f32 %v952_v59  ;;  %v1813_v63 = vmul.f32 -1.442695, %v952_v59 }
0x13e4   :  { %v949_v61 = vpop.f32.mrf.mxu0 }
0x13e5   :  { %2172 = vpow2.f32 %v1813_v63 }
0x13e6   :  { %v1997_v62 = vpop.f32.mrf.mxu0 }
0x13f0   :  { %v2171_v3 = vpop.eup %2170 }
0x13f1   :  { %962 = vrot.lane.b32.xlu0 %v2171_v3, %s2329_s27 }
0x13f2   :  { %v2173_v2 = vpop.eup %2172 }
0x13f3   :  { %v956_v4 = vadd.f32 1.0, %v2173_v2 }
0x13f5   :  { %2174 = vrcp.f32 %v956_v4 }
0x1402   :  { %v2175_v6 = vpop.eup %2174 }
0x1403   :  { %v960_v8 = vmul.f32 0.0, %v2175_v6 }
0x1463   :  { %v963_v5 = vpop.permute.xlu0 %962 }
0x1464   :  { %v965_v7 = vmul.f32 %v2175_v6, %v963_v5 }
0x1466   :  { %967 = vrot.lane.b32.xlu1 %v965_v7, %s2338_s21 }
0x14d8   :  { %v968_v9 = vpop.permute.xlu1 %967 }
0x14d9   :  { %v970_v11 = vadd.f32 %v968_v9, %v960_v8  ;;  %v869_v8 = vadd.f32 %v2581_v49, %v2583_v56 }
0x14db   :  { %2176 = vtanh.f32 %v970_v11 }
0x14dc   :  { %2178 = vtanh.f32 %v741_v13 }
0x14dd   :  { %2180 = vpow2.f32 %v1799_v17 }
0x14e8   :  { %v2177_v15 = vpop.eup %2176 }
0x14e9   :  { %973 = vrot.lane.b32.xlu0 %v2177_v15, %s2329_s27  ;;  %v2179_v16 = vpop.eup %2178 }
0x14ea   :  { %v2181_v18 = vpop.eup %2180 }
0x14eb   :  { %v745_v19 = vadd.f32 1.0, %v2181_v18 }
0x14ed   :  { %751 = vrot.lane.b32.xlu0 %v2179_v16, %s2329_s27  ;;  %2182 = vrcp.f32 %v745_v19 }
0x14fa   :  { %v2183_v10 = vpop.eup %2182 }
0x14fb   :  { %v749_v26 = vmul.f32 %v2183_v10, %v2533_v32 }
0x155b   :  { %v974_v20 = vpop.permute.xlu0 %973 }
0x155c   :  { %v2591_v21 = vmul.f32 %v2175_v6, %v974_v20 }
0x155e   :  { %v993_v22 = vpack.c.bf16 %v2591_v21, %v2591_v21 }
0x155f   :  { %v752_v23 = vpop.permute.xlu0 %751 }
0x1560   :  { %v754_v24 = vmul.f32 %v2183_v10, %v752_v23  ;;  %995 = vrot.lane.b32.xlu1 %v993_v22, %s2338_s21 }
0x1562   :  { %756 = vrot.lane.b32.xlu0 %v754_v24, %s2338_s21 }
0x15d2   :  { %v996_v25 = vpop.permute.xlu1 %995 }
0x15d3   :  { %2003 = vmatmul.mubr.msk.bf16.vlgmr.msra.gmra.mxu0 %vm97_vm1, %v996_v25 }
0x15d4   :  { %v757_v27 = vpop.permute.xlu0 %756  ;;  %2015 = vmatpush3.bf16.msra.mxu0 %v2558_v46  ;;  %2018 = vmatprep.mubr.msk.bf16.mxu0 %vm2336_vm0, %v2335_v0 }
0x15d5   :  { %v759_v28 = vadd.f32 %v757_v27, %v749_v26  ;;  %2016 = vmatprep.subr.bf16.mxu0 %v2335_v0 }
0x15d7   :  { %2184 = vtanh.f32 %v759_v28 }
0x15d8   :  { %2017 = vmatpush3.bf16.msra.mxu0 %v2563_v47 }
0x15d9   :  { %2030 = vmatprep.subr.bf16.mxu0 %v2335_v0 }
0x15e4   :  { %v2185_v29 = vpop.eup %2184 }
0x15e5   :  { %762 = vrot.lane.b32.xlu0 %v2185_v29, %s2329_s27 }
0x15e9   :  { %533 = vrot.lane.b32.xlu0 %v2504_v54, %s2338_s21 }
0x15ed   :  { %689 = vrot.lane.b32.xlu0 %v2550_v38, %s2338_s21 }
0x1657   :  { %v763_v30 = vpop.permute.xlu0 %762 }
0x1658   :  { %v765_v53 = vmul.f32 %v2183_v10, %v763_v30 }
0x165b   :  { %v534_v32 = vpop.permute.xlu0 %533 }
0x165c   :  { %537 = vst.msk [vmem:[#allocation2 + $0x20] sm:$0xff] %vm97_vm1, %v534_v32  ;;  %v872_v32 = vadd.f32 %v2612_v35, %v2583_v56 }
0x165f   :  { %v690_v34 = vpop.permute.xlu0 %689 }
0x1660   :  { %693 = vst.msk [vmem:[#allocation2 + $0x30] sm:$0xff] %vm97_vm1, %v690_v34 }
0x1663   :  { %v781_v60 = vld [vmem:[#allocation2 + $0x20] sm:$0xff] }
0x1667   :  { %v783_v62 = vld [vmem:[#allocation2 + $0x30] sm:$0xff] }
0x1693   :  { %v1034_v12 = vpop.f32.mrf.mxu0 }
0x1694   :  { %v1040_v37 = vadd.f32 %v1034_v12, %v864_v31 }
0x1695   :  { %v2004_v39 = vpop.f32.mrf.mxu0 }
0x1696   :  { %2186 = vtanh.f32 %v1040_v37  ;;  %v1816_v38 = vmul.f32 -1.442695, %v1040_v37 }
0x1697   :  { %v1037_v54 = vpop.f32.mrf.mxu0 }
0x1698   :  { %2188 = vpow2.f32 %v1816_v38 }
0x1699   :  { %v2005_v40 = vpop.f32.mrf.mxu0 }
0x16a3   :  { %v2187_v41 = vpop.eup %2186 }
0x16a4   :  { %1050 = vrot.lane.b32.xlu1 %v2187_v41, %s2329_s27 }
0x16a5   :  { %v2189_v42 = vpop.eup %2188 }
0x16a6   :  { %v1044_v43 = vadd.f32 1.0, %v2189_v42 }
0x16a8   :  { %2190 = vrcp.f32 %v1044_v43 }
0x16b5   :  { %v2191_v51 = vpop.eup %2190 }
0x16b6   :  { %v1048_v45 = vmul.f32 %v2191_v51, %v970_v11 }
0x1716   :  { %v1051_v33 = vpop.permute.xlu1 %1050 }
0x1717   :  { %v1053_v44 = vmul.f32 %v2191_v51, %v1051_v33 }
0x1719   :  { %1055 = vrot.lane.b32.xlu1 %v1053_v44, %s2338_s21 }
0x178b   :  { %v1056_v48 = vpop.permute.xlu1 %1055 }
0x178c   :  { %v1058_v50 = vadd.f32 %v1056_v48, %v1048_v45 }
0x178e   :  { %2192 = vtanh.f32 %v1058_v50 }
0x179b   :  { %v2193_v52 = vpop.eup %2192 }
0x179c   :  { %1061 = vrot.lane.b32.xlu1 %v2193_v52, %s2329_s27 }
0x17a0   :  { %611 = vrot.lane.b32.xlu1 %v2520_v14, %s2338_s21 }
0x17a4   :  { %767 = vrot.lane.b32.xlu1 %v765_v53, %s2338_s21 }
0x180e   :  { %v1062_v55 = vpop.permute.xlu1 %1061 }
0x180f   :  { %v2621_v1 = vmul.f32 %v2191_v51, %v1062_v55 }
0x1811   :  { %v1081_v57 = vpack.c.bf16 %v2621_v1, %v2621_v1 }
0x1812   :  { %v612_v58 = vpop.permute.xlu1 %611 }
0x1813   :  { %615 = vst.msk [vmem:[#allocation2 + $0x28] sm:$0xff] %vm97_vm1, %v612_v58  ;;  %1083 = vrot.lane.b32.xlu0 %v1081_v57, %s2338_s21 }
0x1816   :  { %v768_v59 = vpop.permute.xlu1 %767 }
0x1817   :  { %771 = vst.msk [vmem:[#allocation2 + $0x38] sm:$0xff] %vm97_vm1, %v768_v59 }
0x181a   :  { %v782_v61 = vld [vmem:[#allocation2 + $0x28] sm:$0xff] }
0x181b   :  { %v787_v14 = vpack.c.bf16 %v782_v61, %v781_v60 }
0x181d   :  { %1986 = vmatprep.mubr.msk.bf16.mxu1 %vm97_vm1, %v787_v14 }
0x181e   :  { %v784_v3 = vld [vmem:[#allocation2 + $0x38] sm:$0xff] }
0x181f   :  { %v788_v63 = vpack.c.bf16 %v784_v3, %v783_v62 }
0x1821   :  { %1987 = vmatmul.mubr.msk.bf16.gmra.mxu1 %vm97_vm1, %v788_v63 }
0x1822   :  { %2010 = vmatprep.mubr.msk.bf16.mxu1 %vm2336_vm0, %v2335_v0 }
0x1885   :  { %v1084_v2 = vpop.permute.xlu0 %1083 }
0x1886   :  { %2011 = vmatmul.mubr.msk.bf16.vlgmr.msra.gmra.mxu1 %vm97_vm1, %v1084_v2 }
0x1887   :  { %2023 = vmatpush3.bf16.msra.mxu1 %v2558_v46  ;;  %2026 = vmatprep.mubr.msk.bf16.mxu1 %vm2336_vm0, %v2335_v0 }
0x1888   :  { %2024 = vmatprep.subr.bf16.mxu1 %v2335_v0 }
0x188b   :  { %2025 = vmatpush3.bf16.msra.mxu1 %v2563_v47 }
0x188c   :  { %2038 = vmatprep.subr.bf16.mxu1 %v2335_v0 }
0x18e1   :  { %v2639_v4 = vpop.f32.mrf.mxu1 }
0x18e3   :  { %v2641_v6 = vpop.f32.mrf.mxu1 }
0x18e4   :  { %v877_v53 = vadd.f32 %v2583_v56, %v2641_v6 }
0x18e5   :  { %v2643_v5 = vpop.f32.mrf.mxu1 }
0x18e7   :  { %v2645_v7 = vpop.f32.mrf.mxu1 }
0x1946   :  { %v1122_v9 = vpop.f32.mrf.mxu1 }
0x1947   :  { %v1128_v11 = vadd.f32 %v1122_v9, %v869_v8 }
0x1948   :  { %v2012_v13 = vpop.f32.mrf.mxu1 }
0x1949   :  { %2194 = vtanh.f32 %v1128_v11  ;;  %v1819_v18 = vmul.f32 -1.442695, %v1128_v11 }
0x194a   :  { %v1125_v15 = vpop.f32.mrf.mxu1 }
0x194b   :  { %2196 = vpow2.f32 %v1819_v18 }
0x194c   :  { %v2013_v16 = vpop.f32.mrf.mxu1 }
0x1956   :  { %v2195_v17 = vpop.eup %2194 }
0x1957   :  { %1138 = vrot.lane.b32.xlu1 %v2195_v17, %s2329_s27 }
0x1958   :  { %v2197_v19 = vpop.eup %2196 }
0x1959   :  { %v1132_v20 = vadd.f32 1.0, %v2197_v19  ;;  %v880_v19 = vadd.f32 %v2583_v56, %v2645_v7 }
0x195b   :  { %2198 = vrcp.f32 %v1132_v20 }
0x1968   :  { %v2199_v22 = vpop.eup %2198 }
0x1969   :  { %v1136_v49 = vmul.f32 %v2199_v22, %v1058_v50 }
0x19c9   :  { %v1139_v10 = vpop.permute.xlu1 %1138 }
0x19ca   :  { %v1141_v23 = vmul.f32 %v2199_v22, %v1139_v10 }
0x19cc   :  { %1143 = vrot.lane.b32.xlu0 %v1141_v23, %s2338_s21 }
0x1a3e   :  { %v1144_v24 = vpop.permute.xlu0 %1143 }
0x1a3f   :  { %v1146_v25 = vadd.f32 %v1144_v24, %v1136_v49 }
0x1a41   :  { %2200 = vtanh.f32 %v1146_v25 }
0x1a4e   :  { %v2201_v26 = vpop.eup %2200 }
0x1a4f   :  { %1149 = vrot.lane.b32.xlu1 %v2201_v26, %s2329_s27 }
0x1ac1   :  { %v1150_v27 = vpop.permute.xlu1 %1149 }
0x1ac2   :  { %v2652_v28 = vmul.f32 %v2199_v22, %v1150_v27 }
0x1ac4   :  { %v1169_v29 = vpack.c.bf16 %v2652_v28, %v2652_v28 }
0x1ac6   :  { %1171 = vrot.lane.b32.xlu0 %v1169_v29, %s2338_s21 }
0x1b38   :  { %v1172_v30 = vpop.permute.xlu0 %1171 }
0x1b39   :  { %2019 = vmatmul.mubr.msk.bf16.vlgmr.msra.gmra.mxu0 %vm97_vm1, %v1172_v30 }
0x1b3a   :  { %2031 = vmatpush3.bf16.msra.mxu0 %v2558_v46  ;;  %2034 = vmatprep.mubr.msk.bf16.mxu0 %vm2336_vm0, %v2335_v0 }
0x1b3b   :  { %2032 = vmatprep.subr.bf16.mxu0 %v2335_v0 }
0x1b3e   :  { %2033 = vmatpush3.bf16.msra.mxu0 %v2563_v47 }
0x1b3f   :  { %2046 = vmatprep.subr.bf16.mxu0 %v2335_v0 }
0x1bf9   :  { %v1210_v34 = vpop.f32.mrf.mxu0 }
0x1bfa   :  { %v1216_v36 = vadd.f32 %v1210_v34, %v872_v32 }
0x1bfb   :  { %v2020_v31 = vpop.f32.mrf.mxu0 }
0x1bfc   :  { %2202 = vtanh.f32 %v1216_v36  ;;  %v1822_v54 = vmul.f32 -1.442695, %v1216_v36 }
0x1bfd   :  { %v1213_v12 = vpop.f32.mrf.mxu0 }
0x1bfe   :  { %2204 = vpow2.f32 %v1822_v54 }
0x1bff   :  { %v2021_v37 = vpop.f32.mrf.mxu0 }
0x1c09   :  { %v2203_v39 = vpop.eup %2202 }
0x1c0a   :  { %1226 = vrot.lane.b32.xlu1 %v2203_v39, %s2329_s27  ;;  %v885_v39 = vadd.f32 %v2639_v4, %v2583_v56 }
0x1c0b   :  { %v2205_v40 = vpop.eup %2204 }
0x1c0c   :  { %v1220_v41 = vadd.f32 1.0, %v2205_v40 }
0x1c0e   :  { %2206 = vrcp.f32 %v1220_v41 }
0x1c1b   :  { %v2207_v38 = vpop.eup %2206 }
0x1c1c   :  { %v1224_v35 = vmul.f32 %v2207_v38, %v1146_v25 }
0x1c7c   :  { %v1227_v42 = vpop.permute.xlu1 %1226 }
0x1c7d   :  { %v1229_v43 = vmul.f32 %v2207_v38, %v1227_v42 }
0x1c7f   :  { %1231 = vrot.lane.b32.xlu0 %v1229_v43, %s2338_s21 }
0x1cf1   :  { %v1232_v51 = vpop.permute.xlu0 %1231 }
0x1cf2   :  { %v1234_v33 = vadd.f32 %v1232_v51, %v1224_v35 }
0x1cf4   :  { %2208 = vtanh.f32 %v1234_v33 }
0x1d01   :  { %v2209_v44 = vpop.eup %2208 }
0x1d02   :  { %1237 = vrot.lane.b32.xlu1 %v2209_v44, %s2329_s27 }
0x1d74   :  { %v1238_v45 = vpop.permute.xlu1 %1237 }
0x1d75   :  { %v2669_v48 = vmul.f32 %v2207_v38, %v1238_v45 }
0x1d77   :  { %v1257_v50 = vpack.c.bf16 %v2669_v48, %v2669_v48 }
0x1d79   :  { %1259 = vrot.lane.b32.xlu0 %v1257_v50, %s2338_s21 }
0x1deb   :  { %v1260_v52 = vpop.permute.xlu0 %1259 }
0x1dec   :  { %2027 = vmatmul.mubr.msk.bf16.vlgmr.msra.gmra.mxu1 %vm97_vm1, %v1260_v52 }
0x1ded   :  { %2039 = vmatpush3.bf16.msra.mxu1 %v2558_v46  ;;  %2042 = vmatprep.mubr.msk.bf16.mxu1 %vm2336_vm0, %v2335_v0 }
0x1dee   :  { %2040 = vmatprep.subr.bf16.mxu1 %v2335_v0 }
0x1df1   :  { %2041 = vmatpush3.bf16.msra.mxu1 %v2563_v47 }
0x1eac   :  { %v1298_v55 = vpop.f32.mrf.mxu1 }
0x1ead   :  { %v1304_v57 = vadd.f32 %v1298_v55, %v877_v53 }
0x1eae   :  { %v2028_v58 = vpop.f32.mrf.mxu1 }
0x1eaf   :  { %2210 = vtanh.f32 %v1304_v57  ;;  %v1825_v14 = vmul.f32 -1.442695, %v1304_v57 }
0x1eb0   :  { %v1301_v59 = vpop.f32.mrf.mxu1 }
0x1eb1   :  { %2212 = vpow2.f32 %v1825_v14 }
0x1eb2   :  { %v2029_v60 = vpop.f32.mrf.mxu1 }
0x1ebc   :  { %v2211_v61 = vpop.eup %2210 }
0x1ebd   :  { %1314 = vrot.lane.b32.xlu1 %v2211_v61, %s2329_s27  ;;  %v888_v61 = vadd.f32 %v2643_v5, %v2583_v56 }
0x1ebe   :  { %v2213_v62 = vpop.eup %2212 }
0x1ebf   :  { %v1308_v3 = vadd.f32 1.0, %v2213_v62 }
0x1ec1   :  { %2214 = vrcp.f32 %v1308_v3 }
0x1ece   :  { %v2215_v63 = vpop.eup %2214 }
0x1ecf   :  { %v1312_v6 = vmul.f32 %v2215_v63, %v1234_v33 }
0x1f2f   :  { %v1315_v2 = vpop.permute.xlu1 %1314 }
0x1f30   :  { %v1317_v8 = vmul.f32 %v2215_v63, %v1315_v2 }
0x1f32   :  { %1319 = vrot.lane.b32.xlu0 %v1317_v8, %s2338_s21  ;;  %v67_v8 = vld [vmem:[%s2782_s6] sm:$0xff] }
0x1f33   :  { %vm977_vm2 = vcmp.gt.s32.totalorder %v67_v8, 0  ;;  %vm1065_vm3 = vcmp.gt.s32.totalorder %v67_v8, 1  ;;  %vm1329_vm4 = vcmp.gt.s32.totalorder %v67_v8, 4  ;;  %vm1417_vm5 = vcmp.gt.s32.totalorder %v67_v8, 5 }
0x1f34   :  { %v1826_v5 = vsel %vm1329_vm4, 1.0, %v2335_v0  ;;  %vm1505_vm6 = vcmp.gt.s32.totalorder %v67_v8, 6  ;;  %vm1593_vm7 = vcmp.gt.s32.totalorder %v67_v8, 7  ;;  %vm1153_vm8 = vcmp.gt.s32.totalorder %v67_v8, 2 }
0x1f35   :  { %vm1241_vm9 = vcmp.gt.s32.totalorder %v67_v8, 3 }
0x1fa4   :  { %v1320_v9 = vpop.permute.xlu0 %1319 }
0x1fa5   :  { %v1322_v11 = vadd.f32 %v1320_v9, %v1312_v6  ;;  %v1814_v6 = vsel %vm977_vm2, 1.0, %v2335_v0  ;;  %v1817_v9 = vsel %vm1065_vm3, 1.0, %v2335_v0 }
0x1fa6   :  { %v2083_v56 = vpack.i.bf16 %v1817_v9, %v1814_v6 }
0x1fa7   :  { %2216 = vtanh.f32 %v1322_v11 }
0x1fb4   :  { %v2217_v13 = vpop.eup %2216 }
0x1fb5   :  { %1325 = vrot.lane.b32.xlu1 %v2217_v13, %s2329_s27  ;;  %v1829_v13 = vsel %vm1417_vm5, 1.0, %v2335_v0 }
0x2027   :  { %v1326_v15 = vpop.permute.xlu1 %1325 }
0x2028   :  { %v2685_v16 = vmul.f32 %v2215_v63, %v1326_v15  ;;  %v2094_v15 = vpack.i.bf16 %v1829_v13, %v1826_v5 }
0x202a   :  { %v1345_v17 = vpack.c.bf16 %v2685_v16, %v2685_v16 }
0x202c   :  { %1347 = vrot.lane.b32.xlu0 %v1345_v17, %s2338_s21  ;;  %v1832_v17 = vsel %vm1505_vm6, 1.0, %v2335_v0 }
0x209e   :  { %v1348_v18 = vpop.permute.xlu0 %1347 }
0x209f   :  { %2035 = vmatmul.mubr.msk.bf16.vlgmr.msra.gmra.mxu0 %vm97_vm1, %v1348_v18  ;;  %v1835_v18 = vsel %vm1593_vm7, 1.0, %v2335_v0 }
0x20a0   :  { %2047 = vmatpush3.bf16.msra.mxu0 %v2558_v46  ;;  %2050 = vmatprep.mubr.msk.bf16.mxu0 %vm2336_vm0, %v2335_v0  ;;  %vm1755_vm0 = vcmask 917248  }
0x20a1   :  { %2048 = vmatprep.subr.bf16.mxu0 %v2335_v0 }
0x20a4   :  { %2049 = vmatpush3.bf16.msra.mxu0 %v2563_v47 }
0x215f   :  { %v1386_v20 = vpop.f32.mrf.mxu0 }
0x2160   :  { %v1392_v22 = vadd.f32 %v1386_v20, %v880_v19  ;;  %v2099_v19 = vpack.i.bf16 %v1835_v18, %v1832_v17 }
0x2161   :  { %v2036_v10 = vpop.f32.mrf.mxu0 }
0x2162   :  { %2218 = vtanh.f32 %v1392_v22  ;;  %v1828_v46 = vmul.f32 -1.442695, %v1392_v22 }
0x2163   :  { %v1389_v23 = vpop.f32.mrf.mxu0 }
0x2164   :  { %2220 = vpow2.f32 %v1828_v46  ;;  %v1823_v46 = vsel %vm1241_vm9, 1.0, %v2335_v0 }
0x2165   :  { %v2037_v49 = vpop.f32.mrf.mxu0 }
0x216f   :  { %v2219_v24 = vpop.eup %2218 }
0x2170   :  { %1402 = vrot.lane.b32.xlu1 %v2219_v24, %s2329_s27  ;;  %v1820_v24 = vsel %vm1153_vm8, 1.0, %v2335_v0  ;;  %v2112_v0 = vld [vmem:[%s2780_s4 + $0x8] sm:$0xff]  }
0x2171   :  { %v2221_v25 = vpop.eup %2220  ;;  %2054 = vmatprep.subr.bf16.mxu1 %v2112_v0 }
0x2172   :  { %v1396_v26 = vadd.f32 1.0, %v2221_v25 }
0x2174   :  { %2222 = vrcp.f32 %v1396_v26  ;;  %v2089_v26 = vpack.i.bf16 %v1823_v46, %v1820_v24 }
0x2181   :  { %v2223_v27 = vpop.eup %2222 }
0x2182   :  { %v1400_v7 = vmul.f32 %v2223_v27, %v1322_v11 }
0x21e2   :  { %v1403_v29 = vpop.permute.xlu1 %1402 }
0x21e3   :  { %v1405_v47 = vmul.f32 %v2223_v27, %v1403_v29 }
0x21e5   :  { %1407 = vrot.lane.b32.xlu0 %v1405_v47, %s2338_s21 }
0x2257   :  { %v1408_v30 = vpop.permute.xlu0 %1407 }
0x2258   :  { %v1410_v32 = vadd.f32 %v1408_v30, %v1400_v7 }
0x225a   :  { %2224 = vtanh.f32 %v1410_v32 }
0x2267   :  { %v2225_v34 = vpop.eup %2224 }
0x2268   :  { %1413 = vrot.lane.b32.xlu1 %v2225_v34, %s2329_s27 }
0x22da   :  { %v1414_v36 = vpop.permute.xlu1 %1413 }
0x22db   :  { %v2701_v31 = vmul.f32 %v2223_v27, %v1414_v36 }
0x22dd   :  { %v1433_v12 = vpack.c.bf16 %v2701_v31, %v2701_v31 }
0x22df   :  { %1435 = vrot.lane.b32.xlu0 %v1433_v12, %s2338_s21 }
0x2351   :  { %v1436_v37 = vpop.permute.xlu0 %1435 }
0x2352   :  { %2043 = vmatmul.mubr.msk.bf16.vlgmr.msra.gmra.mxu1 %vm97_vm1, %v1436_v37 }
0x2353   :  { %2055 = vmatpush3.bf16.msra.mxu1 %v2112_v0 }
0x2412   :  { %v1474_v54 = vpop.f32.mrf.mxu1 }
0x2413   :  { %v1480_v40 = vadd.f32 %v1474_v54, %v885_v39 }
0x2414   :  { %v2044_v41 = vpop.f32.mrf.mxu1 }
0x2415   :  { %2226 = vtanh.f32 %v1480_v40  ;;  %v1831_v35 = vmul.f32 -1.442695, %v1480_v40 }
0x2416   :  { %v1477_v38 = vpop.f32.mrf.mxu1 }
0x2417   :  { %2228 = vpow2.f32 %v1831_v35  ;;  %v2113_v38 = vld [vmem:[%s2780_s4] sm:$0xff]  }
0x2418   :  { %v2045_v42 = vpop.f32.mrf.mxu1  ;;  %2056 = vmatprep.subr.bf16.mxu1 %v2113_v38 }
0x2419   :  { %2057 = vmatpush3.bf16.msra.mxu1 %v2113_v38 }
0x2422   :  { %v2227_v43 = vpop.eup %2226 }
0x2423   :  { %1490 = vrot.lane.b32.xlu1 %v2227_v43, %s2329_s27 }
0x2424   :  { %v2229_v51 = vpop.eup %2228 }
0x2425   :  { %v1484_v33 = vadd.f32 1.0, %v2229_v51 }
0x2427   :  { %2230 = vrcp.f32 %v1484_v33 }
0x2434   :  { %v2231_v44 = vpop.eup %2230 }
0x2435   :  { %v1488_v4 = vmul.f32 %v2231_v44, %v1410_v32 }
0x2495   :  { %v1491_v45 = vpop.permute.xlu1 %1490 }
0x2496   :  { %v1493_v50 = vmul.f32 %v2231_v44, %v1491_v45 }
0x2498   :  { %1495 = vrot.lane.b32.xlu0 %v1493_v50, %s2338_s21 }
0x250a   :  { %v1496_v52 = vpop.permute.xlu0 %1495 }
0x250b   :  { %v1498_v53 = vadd.f32 %v1496_v52, %v1488_v4 }
0x250d   :  { %2232 = vtanh.f32 %v1498_v53 }
0x251a   :  { %v2233_v55 = vpop.eup %2232 }
0x251b   :  { %1501 = vrot.lane.b32.xlu1 %v2233_v55, %s2329_s27 }
0x258d   :  { %v1502_v57 = vpop.permute.xlu1 %1501 }
0x258e   :  { %v2712_v58 = vmul.f32 %v2231_v44, %v1502_v57 }
0x2590   :  { %v1521_v59 = vpack.c.bf16 %v2712_v58, %v2712_v58 }
0x2592   :  { %1523 = vrot.lane.b32.xlu0 %v1521_v59, %s2338_s21 }
0x2604   :  { %v1524_v60 = vpop.permute.xlu0 %1523 }
0x2605   :  { %2051 = vmatmul.mubr.msk.bf16.vlgmr.msra.gmra.mxu0 %vm97_vm1, %v1524_v60 }
0x26c5   :  { %v1562_v14 = vpop.f32.mrf.mxu0 }
0x26c6   :  { %v1568_v62 = vadd.f32 %v1562_v14, %v888_v61 }
0x26c7   :  { %v2052_v3 = vpop.f32.mrf.mxu0 }
0x26c8   :  { %2234 = vtanh.f32 %v1568_v62  ;;  %v1834_v20 = vmul.f32 -1.442695, %v1568_v62 }
0x26c9   :  { %v1565_v63 = vpop.f32.mrf.mxu0 }
0x26ca   :  { %2236 = vpow2.f32 %v1834_v20 }
0x26cb   :  { %v2053_v2 = vpop.f32.mrf.mxu0 }
0x26d5   :  { %v2235_v11 = vpop.eup %2234 }
0x26d6   :  { %1578 = vrot.lane.b32.xlu1 %v2235_v11, %s2329_s27 }
0x26d7   :  { %v2237_v22 = vpop.eup %2236 }
0x26d8   :  { %v1572_v10 = vadd.f32 1.0, %v2237_v22 }
0x26da   :  { %2084 = vperm.xlu1 %2082, %v2083_v56   ;;  %2238 = vrcp.f32 %v1572_v10  ;;  %v1836_v56 = vld [vmem:[%s2781_s5] ss:$0 sm:$0xff]  ;;  %s2340_s5 = smov 80  }
0x26de   :  { %2095 = vperm.xlu1 %2082, %v2094_v15  }
0x26e2   :  { %2100 = vperm.xlu1 %2082, %v2099_v19  }
0x26e7   :  { %v2239_v23 = vpop.eup %2238 }
0x26e8   :  { %v1576_v7 = vmul.f32 %v2239_v23, %v1498_v53 }
0x2748   :  { %v1579_v49 = vpop.permute.xlu1 %1578 }
0x2749   :  { %v1581_v25 = vmul.f32 %v2239_v23, %v1579_v49 }
0x274b   :  { %1583 = vrot.lane.b32.xlu0 %v1581_v25, %s2338_s21 }
0x274f   :  { %2090 = vperm.xlu0 %2088, %v2089_v26  }
0x2755   :  { %v2085_v27 = vpop.permute.xlu1 %2084 }
0x2756   :  { %v2086_v29 = vunpack.i.l.bf16 %v2085_v27  ;;  %v2087_v39 = vunpack.i.h.bf16 %v2085_v27 }
0x2758   :  { %v985_v47 = vmul.f32 %v2086_v29, %v2591_v21  ;;  %v1073_v42 = vmul.f32 %v2087_v39, %v2621_v1 }
0x2759   :  { %v2096_v34 = vpop.permute.xlu1 %2095 }
0x275a   :  { %987 = vrot.lane.b32.xlu1 %v985_v47, %s2338_s21  ;;  %v2097_v41 = vunpack.i.l.bf16 %v2096_v34 }
0x275c   :  { %v1337_v35 = vmul.f32 %v2097_v41, %v2685_v16 }
0x275d   :  { %v2101_v36 = vpop.permute.xlu1 %2100 }
0x275e   :  { %v2102_v51 = vunpack.i.l.bf16 %v2101_v36  ;;  %v2103_v45 = vunpack.i.h.bf16 %v2101_v36 }
0x2760   :  { %v1513_v44 = vmul.f32 %v2102_v51, %v2712_v58 }
0x27bd   :  { %v1584_v30 = vpop.permute.xlu0 %1583 }
0x27be   :  { %v1586_v32 = vadd.f32 %v1584_v30, %v1576_v7 }
0x27c0   :  { %2240 = vtanh.f32 %v1586_v32 }
0x27ca   :  { %v2091_v12 = vpop.permute.xlu0 %2090 }
0x27cb   :  { %v2092_v37 = vunpack.i.l.bf16 %v2091_v12  ;;  %v2093_v43 = vunpack.i.h.bf16 %v2091_v12 }
0x27cc   :  { %v988_v54 = vpop.permute.xlu1 %987 }
0x27cd   :  { %v2241_v40 = vpop.eup %2240  ;;  %v1161_v21 = vmul.f32 %v2092_v37, %v2652_v28  ;;  %990 = vst.msk [vmem:[#allocation2] sm:$0xff] %vm97_vm1, %v988_v54  ;;  %v2098_v28 = vunpack.i.h.bf16 %v2096_v34  ;;  %v1249_v33 = vmul.f32 %v2093_v43, %v2669_v48 }
0x27ce   :  { %1589 = vrot.lane.b32.xlu0 %v2241_v40, %s2329_s27 }
0x27cf   :  { %1163 = vrot.lane.b32.xlu1 %v1161_v21, %s2338_s21  ;;  %v1425_v1 = vmul.f32 %v2098_v28, %v2701_v31 }
0x27d2   :  { %1075 = vrot.lane.b32.xlu0 %v1073_v42, %s2338_s21 }
0x27d3   :  { %1339 = vrot.lane.b32.xlu1 %v1337_v35, %s2338_s21 }
0x27d4   :  { %v1607_v58 = vld [vmem:[#allocation2] sm:$0xff] }
0x27d6   :  { %1251 = vrot.lane.b32.xlu0 %v1249_v33, %s2338_s21 }
0x27d7   :  { %1515 = vrot.lane.b32.xlu1 %v1513_v44, %s2338_s21 }
0x27da   :  { %1427 = vrot.lane.b32.xlu0 %v1425_v1, %s2338_s21 }
0x2840   :  { %v1590_v16 = vpop.permute.xlu0 %1589 }
0x2841   :  { %v1592_v50 = vmul.f32 %v2239_v23, %v1590_v16  ;;  %v1164_v4 = vpop.permute.xlu1 %1163 }
0x2842   :  { %1166 = vst.msk [vmem:[#allocation2 + $0x10] sm:$0xff] %vm97_vm1, %v1164_v4 }
0x2843   :  { %v1601_v52 = vmul.f32 %v2103_v45, %v1592_v50 }
0x2844   :  { %v1076_v53 = vpop.permute.xlu0 %1075 }
0x2845   :  { %1078 = vst.msk [vmem:[#allocation2 + $0x8] sm:$0xff] %vm97_vm1, %v1076_v53  ;;  %1603 = vrot.lane.b32.xlu0 %v1601_v52, %s2338_s21  ;;  %v1340_v48 = vpop.permute.xlu1 %1339 }
0x2846   :  { %1342 = vst.msk [vmem:[#allocation2 + $0x20] sm:$0xff] %vm97_vm1, %v1340_v48 }
0x2848   :  { %v1252_v55 = vpop.permute.xlu0 %1251 }
0x2849   :  { %1254 = vst.msk [vmem:[#allocation2 + $0x18] sm:$0xff] %vm97_vm1, %v1252_v55  ;;  %v1516_v31 = vpop.permute.xlu1 %1515  ;;  %v1609_v61 = vld [vmem:[#allocation2 + $0x10] sm:$0xff] }
0x284a   :  { %1518 = vst.msk [vmem:[#allocation2 + $0x30] sm:$0xff] %vm97_vm1, %v1516_v31 }
0x284c   :  { %v1428_v57 = vpop.permute.xlu0 %1427  ;;  %v1608_v59 = vld [vmem:[#allocation2 + $0x8] sm:$0xff] }
0x284d   :  { %1430 = vst.msk [vmem:[#allocation2 + $0x28] sm:$0xff] %vm97_vm1, %v1428_v57  ;;  %v1615_v60 = vpack.c.bf16 %v1608_v59, %v1607_v58  ;;  %v1611_v3 = vld [vmem:[#allocation2 + $0x20] sm:$0xff] }
0x284f   :  { %2058 = vmatprep.mubr.msk.bf16.mxu1 %vm97_vm1, %v1615_v60 }
0x2850   :  { %v1610_v14 = vld [vmem:[#allocation2 + $0x18] sm:$0xff] }
0x2851   :  { %v1616_v62 = vpack.c.bf16 %v1610_v14, %v1609_v61  ;;  %v1613_v6 = vld [vmem:[#allocation2 + $0x30] sm:$0xff] }
0x2853   :  { %2059 = vmatmul.mubr.msk.bf16.vlgmr.msra.gmra.mxu1 %vm97_vm1, %v1616_v62 }
0x2854   :  { %v1612_v63 = vld [vmem:[#allocation2 + $0x28] sm:$0xff] }
0x2855   :  { %v1617_v2 = vpack.c.bf16 %v1612_v63, %v1611_v3 }
0x2857   :  { %2062 = vmatprep.mubr.msk.bf16.mxu1 %vm97_vm1, %v1617_v2 }
0x28b7   :  { %v1604_v8 = vpop.permute.xlu0 %1603 }
0x28b8   :  { %1606 = vst.msk [vmem:[#allocation2 + $0x38] sm:$0xff] %vm97_vm1, %v1604_v8 }
0x28bf   :  { %v1614_v9 = vld [vmem:[#allocation2 + $0x38] sm:$0xff] }
0x28c0   :  { %v1618_v11 = vpack.c.bf16 %v1614_v9, %v1613_v6 }
0x28c2   :  { %2063 = vmatmul.mubr.msk.bf16.gmra.mxu1 %vm97_vm1, %v1618_v11  ;;  %vm1761_vm1 = vcmask 1048448  }
0x2913   :  { %v2060_v5 = vpop.f32.mrf.mxu1 }
0x2914   :  { %v1697_v13 = vadd.f32 %v2060_v5, %v1836_v56 }
0x2915   :  { %v1688_v15 = vpop.f32.mrf.mxu1 }
0x2916   :  { %v1689_v17 = vadd.f32 %v1836_v56, %v1688_v15  ;;  %1728 = vrot.lane.b32.xlu0 %v1697_v13, %s2338_s21 }
0x2917   :  { %v2061_v18 = vpop.f32.mrf.mxu1 }
0x2918   :  { %1720 = vst.msk [vmem:[#allocation10] sm:$0xff] %vm1719_vm10, %v1689_v17  ;;  %v1700_v22 = vadd.f32 %v2061_v18, %v1836_v56 }
0x2919   :  { %v1691_v19 = vpop.f32.mrf.mxu1 }
0x291a   :  { %v1692_v20 = vadd.f32 %v1836_v56, %v1691_v19 }
0x291c   :  { %1722 = vrot.lane.b32.xlu1 %v1692_v20, %s2333_s2 }
0x2920   :  { %1734 = vrot.lane.b32.xlu1 %v1700_v22, %s2339_s9 }
0x2982   :  { %v2064_v10 = vpop.f32.mrf.mxu1 }
0x2983   :  { %v1713_v25 = vadd.f32 %v2064_v10, %v1836_v56 }
0x2984   :  { %v1704_v23 = vpop.f32.mrf.mxu1 }
0x2985   :  { %v1705_v49 = vadd.f32 %v1836_v56, %v1704_v23 }
0x2986   :  { %v2065_v24 = vpop.f32.mrf.mxu1 }
0x2987   :  { %1740 = vrot.lane.b32.xlu0 %v1705_v49, %s2329_s27  ;;  %v1716_v27 = vadd.f32 %v2065_v24, %v1836_v56  ;;  %s2343_s27 = smov [#allocation10]  }
0x2988   :  { %v1707_v46 = vpop.f32.mrf.mxu1  ;;  %v1729_v47 = vpop.permute.xlu0 %1728  ;;  %s1769_s12 = sshll.u32 %s2343_s27, 4  ;;  %s1770_s12 = int_to_ptr.vmem [resolvable:$true] %s1769_s12 }
0x2989   :  { %v1708_v26 = vadd.f32 %v1836_v56, %v1707_v46  ;;  %s2302_s13 = scalar_lea.vmem %s1770_s12, 128  ;;  %p2307_p2 = scmp.lt.s32.totalorder %s1770_s12, %s1770_s12 }
0x298a   :  { %p2303_p1 = scmp.ne.s32.totalorder %s1770_s12, %s2302_s13  ;;  %p2308_p3 = scmp.lt.s32.totalorder %s2302_s13, %s2302_s13 }
0x298b   :  { %1746 = vrot.lane.b32.xlu1 %v1708_v26, %s2340_s5  ;;  %1752 = vrot.lane.b32.xlu0 %v1713_v25, %s2341_s10 }
0x298c   :  { %p2309_p4 = por %p2308_p3, %p2307_p2 }
0x298e   :  { %v1723_v29 = vpop.permute.xlu1 %1722  ;;  %p2310_p5 = pnand %p2309_p4, %p2303_p1 }
0x298f   :  { %1726 = vst.msk [vmem:[#allocation10] sm:$0xff] %vm1725_vm11, %v1723_v29  ;;  %1758 = vrot.lane.b32.xlu1 %v1716_v27, %s2342_s11 }
0x2990   :  { %1732 = vst.msk [vmem:[#allocation10] sm:$0xff] %vm1731_vm12, %v1729_v47 }
0x2992   :  { %v1735_v7 = vpop.permute.xlu1 %1734 }
0x2993   :  { %1738 = vst.msk [vmem:[#allocation10] sm:$0xff] %vm1737_vm13, %v1735_v7 }
0x29f9   :  { %v1741_v30 = vpop.permute.xlu0 %1740 }
0x29fa   :  { %1744 = vst.msk [vmem:[#allocation10] sm:$0xff] %vm1743_vm14, %v1741_v30 }
0x29fd   :  { %v1753_v32 = vpop.permute.xlu0 %1752  ;;  %v1747_v34 = vpop.permute.xlu1 %1746 }
0x29fe   :  { %1750 = vst.msk [vmem:[#allocation10] sm:$0xff] %vm1749_vm15, %v1747_v34 }
0x29ff   :  { %1756 = vst.msk [vmem:[#allocation10] sm:$0xff] %vm1755_vm0, %v1753_v32 }
0x2a01   :  { %v1759_v36 = vpop.permute.xlu1 %1758 }
0x2a02   :  { %1762 = vst.msk [vmem:[#allocation10] sm:$0xff] %vm1761_vm1, %v1759_v36 }
0x2a03   :  { %2313 = shalt.err (!%p2310_p5)
}
0x2a04   :  { %1772 = dma.vmem_to_hbm [thread:$0]  %s1770_s12, 128, %s2783_s7, [#allocation6]  }
0x2a05   :  { %2326 = dma.done.wait [#allocation6], 128  }
0x2a06   :  { %2327 = vsyncadd [#allocation6], 4294967168 }
0x2a07   :  { %1776 = vsyncpa [#allocation5], 1 }
0x2a08   :  { %1777 = vsyncpa [#allocation8], 1 }
0x2a09   :  { %1778 = vsyncpa [#allocation6], 1 }

</bundles_post_ra>
